<compile_context>
chip_gen: v6e
topology: v6e:2x2x1
jax: 0.10.0
libtpu: 0.0.40
codegen_flags: <defaults>
</compile_context>

<pallas_src>
import functools

import jax
import jax.numpy as jnp
from jax import lax
from jax.experimental import pallas as pl
from jax.experimental.pallas import tpu as pltpu


def _up_conv_kernel(xp_ref, bband_ref, bias_ref, gamma_ref, beta_ref,
                    sel_ref, selt_ref, o_ref, *, n_img, eps):
    """Fused conv(3x3, pad=1) on the upsampled image + batch-stat BN + LeakyReLU(0.2).

    xp_ref    : (n_img*(H2+2), W2*Cin)  upsampled rows, H-padded, lane layout w*Cin+cin
    bband_ref : (3, W2*Cin, W2*Cout)    banded weights (W taps + W padding folded in)
    bias_ref  : (1, W2*Cout)            conv bias tiled per lane
    gamma_ref : (1, Cout)               BN gamma
    beta_ref  : (1, Cout)               BN beta
    sel_ref   : (W2*Cout, Cout)         0/1 lane->channel selection
    selt_ref  : (Cout, W2*Cout)         0/1 channel->lane broadcast (= sel.T)
    o_ref     : (n_img*H2, W2*Cout)     lane-dense output
    """
    rows_pad = xp_ref.shape[0] // n_img          # H2 + 2
    h2 = rows_pad - 2
    c_lanes = o_ref.shape[1]                     # W2 * Cout
    cout = gamma_ref.shape[1]
    w2 = c_lanes // cout

    # ---- conv: 3 band matmuls per image, lane-dense output straight off the MXU
    s_lane = jnp.zeros((1, c_lanes), jnp.float32)
    ss_lane = jnp.zeros((1, c_lanes), jnp.float32)
    per_image = []
    for n in range(n_img):
        base = n * rows_pad
        acc = jnp.zeros((h2, c_lanes), jnp.float32)
        for dy in range(3):
            rows = xp_ref[base + dy: base + dy + h2, :]          # (H2, W2*Cin)
            acc = acc + jnp.dot(rows, bband_ref[dy],
                                preferred_element_type=jnp.float32)
        acc = acc + bias_ref[...]
        per_image.append(acc)
        # single-pass BN statistics (sum and sum of squares), still lane-dense
        s_lane = s_lane + jnp.sum(acc, axis=0, keepdims=True)
        ss_lane = ss_lane + jnp.sum(acc * acc, axis=0, keepdims=True)

    # ---- per-channel batch statistics via tiny selection matmuls -------------
    s_ch = jnp.dot(s_lane, sel_ref[...], preferred_element_type=jnp.float32)    # (1, Cout)
    ss_ch = jnp.dot(ss_lane, sel_ref[...], preferred_element_type=jnp.float32)  # (1, Cout)
    inv_count = 1.0 / float(n_img * h2 * w2)
    mean = s_ch * inv_count
    var = ss_ch * inv_count - mean * mean        # biased variance (training-mode BN)
    scale = gamma_ref[...] * lax.rsqrt(var + eps)                 # (1, Cout)
    shift = beta_ref[...] - mean * scale                          # (1, Cout)
    # broadcast back to the interleaved (w, c) lane layout
    scale_lane = jnp.dot(scale, selt_ref[...], preferred_element_type=jnp.float32)
    shift_lane = jnp.dot(shift, selt_ref[...], preferred_element_type=jnp.float32)

    # ---- normalize + LeakyReLU(0.2) + dense store -----------------------------
    for n in range(n_img):
        y = per_image[n] * scale_lane + shift_lane
        y = jnp.where(y >= 0.0, y, 0.2 * y)
        o_ref[n * h2:(n + 1) * h2, :] = y.astype(o_ref.dtype)


@jax.jit
def up_conv_forward(x_nchw, w_oihw, bias, gamma, beta, eps=1e-5):
    """up_conv forward. x: NCHW. w: OIHW (like nn.Conv2d.weight). Returns NCHW."""
    N, Cin, H, W = x_nchw.shape
    Cout = w_oihw.shape[0]
    H2, W2 = 2 * H, 2 * W

    # --- small layout prep in plain JAX (input is tiny; heavy work is in-kernel)
    x = jnp.transpose(x_nchw, (0, 2, 3, 1)).astype(jnp.float32)       # NHWC
    xu = jnp.repeat(jnp.repeat(x, 2, axis=1), 2, axis=2)              # nearest 2x
    xup = jnp.pad(xu, ((0, 0), (1, 1), (0, 0), (0, 0)))               # pad H only
    xp = xup.reshape(N * (H2 + 2), W2 * Cin)                          # rows: w*Cin+cin lanes

    # --- banded weights: fold the 3 W-taps + W zero padding into one matrix per dy
    # bband[dy, wi*Cin+cin, w*Cout+co] = w_hwio[dy, wi-w+1, cin, co] if |wi-w|<=1 else 0
    w_hwio = jnp.transpose(w_oihw, (2, 3, 1, 0)).astype(jnp.float32)  # (3,3,Cin,Cout)
    wi = jnp.arange(W2)[:, None]
    wo = jnp.arange(W2)[None, :]
    dx = wi - wo + 1
    valid = (dx >= 0) & (dx <= 2)
    dx_c = jnp.clip(dx, 0, 2)
    bfull = w_hwio[:, dx_c]                                           # (3, W2, W2, Cin, Cout)
    bfull = jnp.where(valid[None, :, :, None, None], bfull, 0.0)
    bband = jnp.transpose(bfull, (0, 1, 3, 2, 4)).reshape(3, W2 * Cin, W2 * Cout)

    bias_lane = jnp.tile(bias.reshape(1, Cout).astype(jnp.float32), (1, W2))   # (1, W2*Cout)
    sel = jnp.tile(jnp.eye(Cout, dtype=jnp.float32), (W2, 1))                  # (W2*Cout, Cout)
    selt = sel.T                                                               # (Cout, W2*Cout)
    gamma2 = gamma.reshape(1, Cout).astype(jnp.float32)
    beta2 = beta.reshape(1, Cout).astype(jnp.float32)

    out2d = pl.pallas_call(
        functools.partial(_up_conv_kernel, n_img=N, eps=eps),
        out_shape=jax.ShapeDtypeStruct((N * H2, W2 * Cout), jnp.float32),
        in_specs=[pl.BlockSpec(memory_space=pltpu.MemorySpace.VMEM)] * 7,
        out_specs=pl.BlockSpec(memory_space=pltpu.MemorySpace.VMEM),
    )(xp, bband, bias_lane, gamma2, beta2, sel, selt)

    out = out2d.reshape(N, H2, W2, Cout)
    return jnp.transpose(out, (0, 3, 1, 2))                           # back to NCHW


# ------------------------------ pure-JAX reference ------------------------------
def _ref_forward(x_nchw, w_oihw, bias, gamma, beta, eps=1e-5):
    x = jnp.transpose(x_nchw, (0, 2, 3, 1)).astype(jnp.float32)
    xu = jnp.repeat(jnp.repeat(x, 2, axis=1), 2, axis=2)              # nearest 2x
    w_hwio = jnp.transpose(w_oihw, (2, 3, 1, 0)).astype(jnp.float32)
    y = lax.conv_general_dilated(
        xu, w_hwio, window_strides=(1, 1), padding="SAME",
        dimension_numbers=("NHWC", "HWIO", "NHWC"),
        precision=lax.Precision.HIGHEST)
    y = y + bias.reshape(1, 1, 1, -1)
    mean = jnp.mean(y, axis=(0, 1, 2), keepdims=True)
    var = jnp.mean((y - mean) ** 2, axis=(0, 1, 2), keepdims=True)
    y = ((y - mean) * lax.rsqrt(var + eps)
         * gamma.reshape(1, 1, 1, -1) + beta.reshape(1, 1, 1, -1))
    y = jnp.where(y >= 0.0, y, 0.2 * y)
    return jnp.transpose(y, (0, 3, 1, 2))


# ------------------------------------ main ---------------------------------------
if __name__ == "__main__":
    key = jax.random.PRNGKey(0)
    kx, kw, kb = jax.random.split(key, 3)

    N, Cin, H, W = 2, 4, 16, 16
    Cout = 8

    x = jax.random.normal(kx, (N, Cin, H, W), jnp.float32)
    w = 0.1 * jax.random.normal(kw, (Cout, Cin, 3, 3), jnp.float32)   # OIHW (nn.Conv2d)
    b = 0.1 * jax.random.normal(kb, (Cout,), jnp.float32)             # conv bias
    gamma = jnp.ones((Cout,), jnp.float32)                            # BN init
    beta = jnp.zeros((Cout,), jnp.float32)

    out = jax.block_until_ready(up_conv_forward(x, w, b, gamma, beta))
    ref = jax.block_until_ready(_ref_forward(x, w, b, gamma, beta))

    assert out.shape == (N, Cout, 2 * H, 2 * W), out.shape
    max_err = float(jnp.max(jnp.abs(out - ref)))
    assert jnp.allclose(out, ref, atol=1e-3, rtol=1e-3), max_err

    print("KERNEL_OK")
</pallas_src>

<mosaic_0001>
module attributes {stable_mosaic.version = 11 : i64} {
  func.func @_up_conv_kernel(%arg0: memref<68x128xf32, #tpu.memory_space<vmem>>, %arg1: memref<3x128x256xf32, #tpu.memory_space<vmem>>, %arg2: memref<1x256xf32, #tpu.memory_space<vmem>>, %arg3: memref<1x8xf32, #tpu.memory_space<vmem>>, %arg4: memref<1x8xf32, #tpu.memory_space<vmem>>, %arg5: memref<256x8xf32, #tpu.memory_space<vmem>>, %arg6: memref<8x256xf32, #tpu.memory_space<vmem>>, %arg7: memref<64x256xf32, #tpu.memory_space<vmem>>) attributes {dimension_semantics = [], scalar_prefetch = 0 : i64, scratch_operands = 0 : i64, tpu.core_type = #tpu.core_type<tc>} {
    %cst = arith.constant 0.000000e+00 : f32
    %0 = vector.broadcast %cst : f32 to vector<1x256xf32>
    %cst_0 = arith.constant 0.000000e+00 : f32
    %1 = vector.broadcast %cst_0 : f32 to vector<1x256xf32>
    %cst_1 = arith.constant 0.000000e+00 : f32
    %2 = vector.broadcast %cst_1 : f32 to vector<32x256xf32>
    %c0 = arith.constant 0 : index
    %c0_2 = arith.constant 0 : index
    %3 = vector.load %arg0[%c0, %c0_2] : memref<68x128xf32, #tpu.memory_space<vmem>>, vector<32x128xf32>
    %c0_3 = arith.constant 0 : index
    %c0_4 = arith.constant 0 : index
    %c0_5 = arith.constant 0 : index
    %4 = vector.load %arg1[%c0_3, %c0_4, %c0_5] : memref<3x128x256xf32, #tpu.memory_space<vmem>>, vector<1x128x256xf32>
    %5 = vector.shape_cast %4 : vector<1x128x256xf32> to vector<128x256xf32>
    %cst_6 = arith.constant dense<0.000000e+00> : vector<32x256xf32>
    %6 = tpu.matmul %3, %5, %cst_6 {dimension_numbers = #tpu.dot_dimension_numbers<[1], [0], [0], [1], [0, 0, 1, 1], [], []>} : vector<32x128xf32>, vector<128x256xf32>, vector<32x256xf32> -> vector<32x256xf32>
    %7 = arith.addf %2, %6 : vector<32x256xf32>
    %c1 = arith.constant 1 : index
    %c0_7 = arith.constant 0 : index
    %8 = vector.load %arg0[%c1, %c0_7] : memref<68x128xf32, #tpu.memory_space<vmem>>, vector<32x128xf32>
    %c1_8 = arith.constant 1 : index
    %c0_9 = arith.constant 0 : index
    %c0_10 = arith.constant 0 : index
    %9 = vector.load %arg1[%c1_8, %c0_9, %c0_10] : memref<3x128x256xf32, #tpu.memory_space<vmem>>, vector<1x128x256xf32>
    %10 = vector.shape_cast %9 : vector<1x128x256xf32> to vector<128x256xf32>
    %cst_11 = arith.constant dense<0.000000e+00> : vector<32x256xf32>
    %11 = tpu.matmul %8, %10, %cst_11 {dimension_numbers = #tpu.dot_dimension_numbers<[1], [0], [0], [1], [0, 0, 1, 1], [], []>} : vector<32x128xf32>, vector<128x256xf32>, vector<32x256xf32> -> vector<32x256xf32>
    %12 = arith.addf %7, %11 : vector<32x256xf32>
    %c2 = arith.constant 2 : index
    %c0_12 = arith.constant 0 : index
    %13 = vector.load %arg0[%c2, %c0_12] : memref<68x128xf32, #tpu.memory_space<vmem>>, vector<32x128xf32>
    %c2_13 = arith.constant 2 : index
    %c0_14 = arith.constant 0 : index
    %c0_15 = arith.constant 0 : index
    %14 = vector.load %arg1[%c2_13, %c0_14, %c0_15] : memref<3x128x256xf32, #tpu.memory_space<vmem>>, vector<1x128x256xf32>
    %15 = vector.shape_cast %14 : vector<1x128x256xf32> to vector<128x256xf32>
    %cst_16 = arith.constant dense<0.000000e+00> : vector<32x256xf32>
    %16 = tpu.matmul %13, %15, %cst_16 {dimension_numbers = #tpu.dot_dimension_numbers<[1], [0], [0], [1], [0, 0, 1, 1], [], []>} : vector<32x128xf32>, vector<128x256xf32>, vector<32x256xf32> -> vector<32x256xf32>
    %17 = arith.addf %12, %16 : vector<32x256xf32>
    %c0_17 = arith.constant 0 : index
    %c0_18 = arith.constant 0 : index
    %18 = vector.load %arg2[%c0_17, %c0_18] : memref<1x256xf32, #tpu.memory_space<vmem>>, vector<1x256xf32>
    %19 = vector.broadcast %18 : vector<1x256xf32> to vector<32x256xf32>
    %20 = arith.addf %17, %19 : vector<32x256xf32>
    %cst_19 = arith.constant dense<0.000000e+00> : vector<256xf32>
    %21 = vector.multi_reduction <add>, %20, %cst_19 [0] : vector<32x256xf32> to vector<256xf32>
    %22 = vector.shape_cast %21 : vector<256xf32> to vector<1x256xf32>
    %23 = arith.addf %0, %22 : vector<1x256xf32>
    %24 = arith.mulf %20, %20 : vector<32x256xf32>
    %cst_20 = arith.constant dense<0.000000e+00> : vector<256xf32>
    %25 = vector.multi_reduction <add>, %24, %cst_20 [0] : vector<32x256xf32> to vector<256xf32>
    %26 = vector.shape_cast %25 : vector<256xf32> to vector<1x256xf32>
    %27 = arith.addf %1, %26 : vector<1x256xf32>
    %cst_21 = arith.constant 0.000000e+00 : f32
    %28 = vector.broadcast %cst_21 : f32 to vector<32x256xf32>
    %c34 = arith.constant 34 : index
    %c0_22 = arith.constant 0 : index
    %29 = vector.load %arg0[%c34, %c0_22] : memref<68x128xf32, #tpu.memory_space<vmem>>, vector<32x128xf32>
    %c0_23 = arith.constant 0 : index
    %c0_24 = arith.constant 0 : index
    %c0_25 = arith.constant 0 : index
    %30 = vector.load %arg1[%c0_23, %c0_24, %c0_25] : memref<3x128x256xf32, #tpu.memory_space<vmem>>, vector<1x128x256xf32>
    %31 = vector.shape_cast %30 : vector<1x128x256xf32> to vector<128x256xf32>
    %cst_26 = arith.constant dense<0.000000e+00> : vector<32x256xf32>
    %32 = tpu.matmul %29, %31, %cst_26 {dimension_numbers = #tpu.dot_dimension_numbers<[1], [0], [0], [1], [0, 0, 1, 1], [], []>} : vector<32x128xf32>, vector<128x256xf32>, vector<32x256xf32> -> vector<32x256xf32>
    %33 = arith.addf %28, %32 : vector<32x256xf32>
    %c35 = arith.constant 35 : index
    %c0_27 = arith.constant 0 : index
    %34 = vector.load %arg0[%c35, %c0_27] : memref<68x128xf32, #tpu.memory_space<vmem>>, vector<32x128xf32>
    %c1_28 = arith.constant 1 : index
    %c0_29 = arith.constant 0 : index
    %c0_30 = arith.constant 0 : index
    %35 = vector.load %arg1[%c1_28, %c0_29, %c0_30] : memref<3x128x256xf32, #tpu.memory_space<vmem>>, vector<1x128x256xf32>
    %36 = vector.shape_cast %35 : vector<1x128x256xf32> to vector<128x256xf32>
    %cst_31 = arith.constant dense<0.000000e+00> : vector<32x256xf32>
    %37 = tpu.matmul %34, %36, %cst_31 {dimension_numbers = #tpu.dot_dimension_numbers<[1], [0], [0], [1], [0, 0, 1, 1], [], []>} : vector<32x128xf32>, vector<128x256xf32>, vector<32x256xf32> -> vector<32x256xf32>
    %38 = arith.addf %33, %37 : vector<32x256xf32>
    %c36 = arith.constant 36 : index
    %c0_32 = arith.constant 0 : index
    %39 = vector.load %arg0[%c36, %c0_32] : memref<68x128xf32, #tpu.memory_space<vmem>>, vector<32x128xf32>
    %c2_33 = arith.constant 2 : index
    %c0_34 = arith.constant 0 : index
    %c0_35 = arith.constant 0 : index
    %40 = vector.load %arg1[%c2_33, %c0_34, %c0_35] : memref<3x128x256xf32, #tpu.memory_space<vmem>>, vector<1x128x256xf32>
    %41 = vector.shape_cast %40 : vector<1x128x256xf32> to vector<128x256xf32>
    %cst_36 = arith.constant dense<0.000000e+00> : vector<32x256xf32>
    %42 = tpu.matmul %39, %41, %cst_36 {dimension_numbers = #tpu.dot_dimension_numbers<[1], [0], [0], [1], [0, 0, 1, 1], [], []>} : vector<32x128xf32>, vector<128x256xf32>, vector<32x256xf32> -> vector<32x256xf32>
    %43 = arith.addf %38, %42 : vector<32x256xf32>
    %c0_37 = arith.constant 0 : index
    %c0_38 = arith.constant 0 : index
    %44 = vector.load %arg2[%c0_37, %c0_38] : memref<1x256xf32, #tpu.memory_space<vmem>>, vector<1x256xf32>
    %45 = vector.broadcast %44 : vector<1x256xf32> to vector<32x256xf32>
    %46 = arith.addf %43, %45 : vector<32x256xf32>
    %cst_39 = arith.constant dense<0.000000e+00> : vector<256xf32>
    %47 = vector.multi_reduction <add>, %46, %cst_39 [0] : vector<32x256xf32> to vector<256xf32>
    %48 = vector.shape_cast %47 : vector<256xf32> to vector<1x256xf32>
    %49 = arith.addf %23, %48 : vector<1x256xf32>
    %50 = arith.mulf %46, %46 : vector<32x256xf32>
    %cst_40 = arith.constant dense<0.000000e+00> : vector<256xf32>
    %51 = vector.multi_reduction <add>, %50, %cst_40 [0] : vector<32x256xf32> to vector<256xf32>
    %52 = vector.shape_cast %51 : vector<256xf32> to vector<1x256xf32>
    %53 = arith.addf %27, %52 : vector<1x256xf32>
    %c0_41 = arith.constant 0 : index
    %c0_42 = arith.constant 0 : index
    %54 = vector.load %arg5[%c0_41, %c0_42] : memref<256x8xf32, #tpu.memory_space<vmem>>, vector<256x8xf32>
    %cst_43 = arith.constant dense<0.000000e+00> : vector<1x8xf32>
    %55 = tpu.matmul %49, %54, %cst_43 {dimension_numbers = #tpu.dot_dimension_numbers<[1], [0], [0], [1], [0, 0, 1, 1], [], []>} : vector<1x256xf32>, vector<256x8xf32>, vector<1x8xf32> -> vector<1x8xf32>
    %c0_44 = arith.constant 0 : index
    %c0_45 = arith.constant 0 : index
    %56 = vector.load %arg5[%c0_44, %c0_45] : memref<256x8xf32, #tpu.memory_space<vmem>>, vector<256x8xf32>
    %cst_46 = arith.constant dense<0.000000e+00> : vector<1x8xf32>
    %57 = tpu.matmul %53, %56, %cst_46 {dimension_numbers = #tpu.dot_dimension_numbers<[1], [0], [0], [1], [0, 0, 1, 1], [], []>} : vector<1x256xf32>, vector<256x8xf32>, vector<1x8xf32> -> vector<1x8xf32>
    %cst_47 = arith.constant 4.8828125E-4 : f32
    %58 = vector.broadcast %cst_47 : f32 to vector<1x8xf32>
    %59 = arith.mulf %55, %58 : vector<1x8xf32>
    %cst_48 = arith.constant 4.8828125E-4 : f32
    %60 = vector.broadcast %cst_48 : f32 to vector<1x8xf32>
    %61 = arith.mulf %57, %60 : vector<1x8xf32>
    %62 = arith.mulf %59, %59 : vector<1x8xf32>
    %63 = arith.subf %61, %62 : vector<1x8xf32>
    %c0_49 = arith.constant 0 : index
    %c0_50 = arith.constant 0 : index
    %64 = vector.load %arg3[%c0_49, %c0_50] : memref<1x8xf32, #tpu.memory_space<vmem>>, vector<1x8xf32>
    %cst_51 = arith.constant 9.99999974E-6 : f32
    %65 = vector.broadcast %cst_51 : f32 to vector<1x8xf32>
    %66 = arith.addf %63, %65 : vector<1x8xf32>
    %67 = math.rsqrt %66 : vector<1x8xf32>
    %68 = arith.mulf %64, %67 : vector<1x8xf32>
    %c0_52 = arith.constant 0 : index
    %c0_53 = arith.constant 0 : index
    %69 = vector.load %arg4[%c0_52, %c0_53] : memref<1x8xf32, #tpu.memory_space<vmem>>, vector<1x8xf32>
    %70 = arith.mulf %59, %68 : vector<1x8xf32>
    %71 = arith.subf %69, %70 : vector<1x8xf32>
    %c0_54 = arith.constant 0 : index
    %c0_55 = arith.constant 0 : index
    %72 = vector.load %arg6[%c0_54, %c0_55] : memref<8x256xf32, #tpu.memory_space<vmem>>, vector<8x256xf32>
    %cst_56 = arith.constant dense<0.000000e+00> : vector<1x256xf32>
    %73 = tpu.matmul %68, %72, %cst_56 {dimension_numbers = #tpu.dot_dimension_numbers<[1], [0], [0], [1], [0, 0, 1, 1], [], []>} : vector<1x8xf32>, vector<8x256xf32>, vector<1x256xf32> -> vector<1x256xf32>
    %c0_57 = arith.constant 0 : index
    %c0_58 = arith.constant 0 : index
    %74 = vector.load %arg6[%c0_57, %c0_58] : memref<8x256xf32, #tpu.memory_space<vmem>>, vector<8x256xf32>
    %cst_59 = arith.constant dense<0.000000e+00> : vector<1x256xf32>
    %75 = tpu.matmul %71, %74, %cst_59 {dimension_numbers = #tpu.dot_dimension_numbers<[1], [0], [0], [1], [0, 0, 1, 1], [], []>} : vector<1x8xf32>, vector<8x256xf32>, vector<1x256xf32> -> vector<1x256xf32>
    %76 = vector.broadcast %73 : vector<1x256xf32> to vector<32x256xf32>
    %77 = arith.mulf %20, %76 : vector<32x256xf32>
    %78 = vector.broadcast %75 : vector<1x256xf32> to vector<32x256xf32>
    %79 = arith.addf %77, %78 : vector<32x256xf32>
    %cst_60 = arith.constant 0.000000e+00 : f32
    %80 = vector.broadcast %cst_60 : f32 to vector<32x256xf32>
    %81 = arith.cmpf oge, %79, %80 : vector<32x256xf32>
    %cst_61 = arith.constant 2.000000e-01 : f32
    %82 = vector.broadcast %cst_61 : f32 to vector<32x256xf32>
    %83 = arith.mulf %82, %79 : vector<32x256xf32>
    %84 = arith.select %81, %79, %83 : vector<32x256xi1>, vector<32x256xf32>
    %c0_62 = arith.constant 0 : index
    %c0_63 = arith.constant 0 : index
    %85 = vector.load %arg7[%c0_62, %c0_63] : memref<64x256xf32, #tpu.memory_space<vmem>>, vector<32x256xf32>
    tpu.vector_store %arg7[%c0_62, %c0_63], %84 {strides = array<i32>} : memref<64x256xf32, #tpu.memory_space<vmem>>, vector<32x256xf32>,
    %86 = vector.broadcast %73 : vector<1x256xf32> to vector<32x256xf32>
    %87 = arith.mulf %46, %86 : vector<32x256xf32>
    %88 = vector.broadcast %75 : vector<1x256xf32> to vector<32x256xf32>
    %89 = arith.addf %87, %88 : vector<32x256xf32>
    %cst_64 = arith.constant 0.000000e+00 : f32
    %90 = vector.broadcast %cst_64 : f32 to vector<32x256xf32>
    %91 = arith.cmpf oge, %89, %90 : vector<32x256xf32>
    %cst_65 = arith.constant 2.000000e-01 : f32
    %92 = vector.broadcast %cst_65 : f32 to vector<32x256xf32>
    %93 = arith.mulf %92, %89 : vector<32x256xf32>
    %94 = arith.select %91, %89, %93 : vector<32x256xi1>, vector<32x256xf32>
    %c32 = arith.constant 32 : index
    %c0_66 = arith.constant 0 : index
    %95 = vector.load %arg7[%c32, %c0_66] : memref<64x256xf32, #tpu.memory_space<vmem>>, vector<32x256xf32>
    tpu.vector_store %arg7[%c32, %c0_66], %94 {strides = array<i32>} : memref<64x256xf32, #tpu.memory_space<vmem>>, vector<32x256xf32>,
    return
  }
}

</mosaic_0001>

<bundles_post_ra>
// kernel: tile.17
= control target key start
LH: loop header
LB: loop body
LE: loop exit
PB: predicated region body
PF: predicated region fallthrough
CT: control target
= control target key end

     0   :  { %vm55_vm0 = vcmask 1041409   ;;  %vm59_vm1 = vcmask 1042434   ;;  %vm63_vm2 = vcmask 1043459   ;;  %vm67_vm3 = vcmask 1044484   ;;  %s1367_s27 = smov 112   ;;  %s1368_s11 = smov 120   ;;  %s2478_s0 = inlined_call_operand.vmem [shape: f32[32,8,8], index: 0, kind: input, shape index: {}]   ;;  %s2479_s1 = inlined_call_operand.vmem [shape: f32[256,8], index: 1, kind: output, shape index: {}]  }
   0x1   :  { %vm71_vm4 = vcmask 1045509   ;;  %vm75_vm5 = vcmask 1046534   ;;  %vm79_vm6 = vcmask 1047559   ;;  %v1114_v0 = vld [vmem:[%s2478_s0 + $0xe] sm:$0x1]   ;;  %s1369_s30 = smov 104  }
   0x2   :  { %v1115_v1 = vld [vmem:[%s2478_s0 + $0x2d] sm:$0x2]   ;;  %v1097_v10 = vld [vmem:[%s2478_s0 + $0xf] sm:$0x1]   ;;  %v1122_v24 = vld [vmem:[%s2478_s0 + $0x1e] sm:$0x1]  }
   0x3   :  { %v1116_v2 = vld [vmem:[%s2478_s0 + $0x4c] sm:$0x4]   ;;  %v125_v4 = vsel %vm55_vm0, %v1115_v1, %v1114_v0  ;;  %v1098_v11 = vld [vmem:[%s2478_s0 + $0x2e] sm:$0x2]   ;;  %v1123_v25 = vld [vmem:[%s2478_s0 + $0x3d] sm:$0x2]  }
   0x4   :  { %v1117_v3 = vld [vmem:[%s2478_s0 + $0x6b] sm:$0x8]   ;;  %v129_v8 = vsel %vm59_vm1, %v1116_v2, %v125_v4  ;;  %v56_v13 = vsel %vm55_vm0, %v1098_v11, %v1097_v10  ;;  %v1099_v14 = vld [vmem:[%s2478_s0 + $0x4d] sm:$0x4]   ;;  %v1124_v26 = vld [vmem:[%s2478_s0 + $0x5c] sm:$0x4]   ;;  %v159_v29 = vsel %vm55_vm0, %v1123_v25, %v1122_v24 }
   0x5   :  { %v1118_v5 = vld [vmem:[%s2478_s0 + $0x8a] sm:$0x10]   ;;  %v133_v12 = vsel %vm63_vm2, %v1117_v3, %v129_v8  ;;  %v1100_v15 = vld [vmem:[%s2478_s0 + $0x6c] sm:$0x8]   ;;  %v60_v18 = vsel %vm59_vm1, %v1099_v14, %v56_v13  ;;  %v1125_v30 = vld [vmem:[%s2478_s0 + $0x7b] sm:$0x8]   ;;  %v163_v35 = vsel %vm59_vm1, %v1124_v26, %v159_v29 }
   0x6   :  { %v1119_v6 = vld [vmem:[%s2478_s0 + $0xa9] sm:$0x20]   ;;  %v1101_v16 = vld [vmem:[%s2478_s0 + $0x8b] sm:$0x10]   ;;  %v137_v17 = vsel %vm67_vm3, %v1118_v5, %v133_v12  ;;  %v64_v23 = vsel %vm63_vm2, %v1100_v15, %v60_v18  ;;  %v1126_v31 = vld [vmem:[%s2478_s0 + $0x9a] sm:$0x10]   ;;  %v167_v40 = vsel %vm63_vm2, %v1125_v30, %v163_v35 }
   0x7   :  { %v1120_v7 = vld [vmem:[%s2478_s0 + $0xc8] sm:$0x40]   ;;  %v1102_v19 = vld [vmem:[%s2478_s0 + $0xaa] sm:$0x20]   ;;  %v141_v22 = vsel %vm71_vm4, %v1119_v6, %v137_v17  ;;  %v68_v28 = vsel %vm67_vm3, %v1101_v16, %v64_v23  ;;  %v1127_v32 = vld [vmem:[%s2478_s0 + $0xb9] sm:$0x20]   ;;  %v171_v45 = vsel %vm67_vm3, %v1126_v31, %v167_v40 }
   0x8   :  { %v1121_v9 = vld [vmem:[%s2478_s0 + $0xe7] sm:$0x80]   ;;  %v1103_v20 = vld [vmem:[%s2478_s0 + $0xc9] sm:$0x40]   ;;  %v145_v27 = vsel %vm75_vm5, %v1120_v7, %v141_v22  ;;  %v72_v34 = vsel %vm71_vm4, %v1102_v19, %v68_v28  ;;  %v1128_v36 = vld [vmem:[%s2478_s0 + $0xd8] sm:$0x40]   ;;  %v175_v50 = vsel %vm71_vm4, %v1127_v32, %v171_v45 }
   0x9   :  { %v1104_v21 = vld [vmem:[%s2478_s0 + $0xe8] sm:$0x80]   ;;  %v149_v33 = vsel %vm79_vm6, %v1121_v9, %v145_v27  ;;  %v1129_v37 = vld [vmem:[%s2478_s0 + $0xf7] sm:$0x80]   ;;  %v1105_v38 = vld [vmem:[%s2478_s0 + $0x1f] sm:$0x1]   ;;  %v76_v39 = vsel %vm75_vm5, %v1103_v20, %v72_v34  ;;  %v179_v55 = vsel %vm75_vm5, %v1128_v36, %v175_v50 }
   0xa   :  { %150 = vrot.lane.b32.xlu1 %v149_v33, %s1367_s27  ;;  %v1106_v41 = vld [vmem:[%s2478_s0 + $0x3e] sm:$0x2]   ;;  %v80_v44 = vsel %vm79_vm6, %v1104_v21, %v76_v39  ;;  %v1139_v53 = vld [vmem:[%s2478_s0 + $0x1d] sm:$0x1]   ;;  %v183_v61 = vsel %vm79_vm6, %v1129_v37, %v179_v55  ;;  %v1131_v5 = vld [vmem:[%s2478_s0 + $0xd] sm:$0x1]  }
   0xb   :  { %v1107_v42 = vld [vmem:[%s2478_s0 + $0x5d] sm:$0x4]   ;;  %v90_v46 = vsel %vm55_vm0, %v1106_v41, %v1105_v38  ;;  %81 = vrot.lane.b32.xlu0 %v80_v44, %s1368_s11  ;;  %v1140_v54 = vld [vmem:[%s2478_s0 + $0x3c] sm:$0x2]   ;;  %v1132_v6 = vld [vmem:[%s2478_s0 + $0x2c] sm:$0x2]  }
   0xc   :  { %v1108_v43 = vld [vmem:[%s2478_s0 + $0x7c] sm:$0x8]   ;;  %v94_v51 = vsel %vm59_vm1, %v1107_v42, %v90_v46  ;;  %v228_v57 = vsel %vm55_vm0, %v1140_v54, %v1139_v53  ;;  %v1141_v58 = vld [vmem:[%s2478_s0 + $0x5b] sm:$0x4]   ;;  %v1133_v7 = vld [vmem:[%s2478_s0 + $0x4b] sm:$0x4]   ;;  %v194_v10 = vsel %vm55_vm0, %v1132_v6, %v1131_v5 }
   0xd   :  { %v1109_v47 = vld [vmem:[%s2478_s0 + $0x9b] sm:$0x10]   ;;  %v98_v56 = vsel %vm63_vm2, %v1108_v43, %v94_v51  ;;  %v1142_v59 = vld [vmem:[%s2478_s0 + $0x7a] sm:$0x8]   ;;  %v232_v63 = vsel %vm59_vm1, %v1141_v58, %v228_v57  ;;  %v1134_v11 = vld [vmem:[%s2478_s0 + $0x6a] sm:$0x8]   ;;  %v198_v16 = vsel %vm59_vm1, %v1133_v7, %v194_v10 }
   0xe   :  { %v1110_v48 = vld [vmem:[%s2478_s0 + $0xba] sm:$0x20]   ;;  %v1143_v60 = vld [vmem:[%s2478_s0 + $0x99] sm:$0x10]   ;;  %v102_v62 = vsel %vm67_vm3, %v1109_v47, %v98_v56  ;;  %184 = vrot.lane.b32.xlu1 %v183_v61, %s1367_s27  ;;  %v236_v4 = vsel %vm63_vm2, %v1142_v59, %v232_v63  ;;  %v1135_v12 = vld [vmem:[%s2478_s0 + $0x89] sm:$0x10]   ;;  %v202_v20 = vsel %vm63_vm2, %v1134_v11, %v198_v16 }
   0xf   :  { %v1111_v49 = vld [vmem:[%s2478_s0 + $0xd9] sm:$0x40]   ;;  %v1144_v0 = vld [vmem:[%s2478_s0 + $0xb8] sm:$0x20]   ;;  %v106_v3 = vsel %vm71_vm4, %v1110_v48, %v102_v62  ;;  %v240_v9 = vsel %vm67_vm3, %v1143_v60, %v236_v4  ;;  %v1136_v13 = vld [vmem:[%s2478_s0 + $0xa8] sm:$0x20]   ;;  %v206_v25 = vsel %vm67_vm3, %v1135_v12, %v202_v20 }
  0x10   :  { %v1112_v52 = vld [vmem:[%s2478_s0 + $0xf8] sm:$0x80]   ;;  %v1145_v1 = vld [vmem:[%s2478_s0 + $0xd7] sm:$0x40]   ;;  %v110_v8 = vsel %vm75_vm5, %v1111_v49, %v106_v3  ;;  %v244_v15 = vsel %vm71_vm4, %v1144_v0, %v240_v9  ;;  %v1137_v17 = vld [vmem:[%s2478_s0 + $0xc7] sm:$0x40]   ;;  %v210_v30 = vsel %vm71_vm4, %v1136_v13, %v206_v25 }
  0x11   :  { %v1146_v2 = vld [vmem:[%s2478_s0 + $0xf6] sm:$0x80]   ;;  %v114_v14 = vsel %vm79_vm6, %v1112_v52, %v110_v8  ;;  %v1138_v18 = vld [vmem:[%s2478_s0 + $0xe6] sm:$0x80]   ;;  %v248_v19 = vsel %vm75_vm5, %v1145_v1, %v244_v15  ;;  %v1156_v21 = vld [vmem:[%s2478_s0 + $0x1c] sm:$0x1]   ;;  %v214_v35 = vsel %vm75_vm5, %v1137_v17, %v210_v30 }
  0x12   :  { %115 = vrot.lane.b32.xlu0 %v114_v14, %s1368_s11  ;;  %v1157_v22 = vld [vmem:[%s2478_s0 + $0x3b] sm:$0x2]   ;;  %v252_v24 = vsel %vm79_vm6, %v1146_v2, %v248_v19  ;;  %v1148_v34 = vld [vmem:[%s2478_s0 + $0xc] sm:$0x1]   ;;  %v218_v40 = vsel %vm79_vm6, %v1138_v18, %v214_v35  ;;  %v1173_v49 = vld [vmem:[%s2478_s0 + $0x1b] sm:$0x1]  }
  0x13   :  { %v1158_v23 = vld [vmem:[%s2478_s0 + $0x5a] sm:$0x4]   ;;  %v297_v26 = vsel %vm55_vm0, %v1157_v22, %v1156_v21  ;;  %253 = vrot.lane.b32.xlu1 %v252_v24, %s1369_s30  ;;  %v1149_v37 = vld [vmem:[%s2478_s0 + $0x2b] sm:$0x2]   ;;  %v1174_v50 = vld [vmem:[%s2478_s0 + $0x3a] sm:$0x2]  }
  0x14   :  { %v1159_v27 = vld [vmem:[%s2478_s0 + $0x79] sm:$0x8]   ;;  %v301_v31 = vsel %vm59_vm1, %v1158_v23, %v297_v26  ;;  %v1150_v38 = vld [vmem:[%s2478_s0 + $0x4a] sm:$0x4]   ;;  %v263_v42 = vsel %vm55_vm0, %v1149_v37, %v1148_v34  ;;  %v366_v53 = vsel %vm55_vm0, %v1174_v50, %v1173_v49  ;;  %v1175_v54 = vld [vmem:[%s2478_s0 + $0x59] sm:$0x4]  }
  0x15   :  { %v1160_v28 = vld [vmem:[%s2478_s0 + $0x98] sm:$0x10]   ;;  %v305_v36 = vsel %vm63_vm2, %v1159_v27, %v301_v31  ;;  %v1151_v39 = vld [vmem:[%s2478_s0 + $0x69] sm:$0x8]   ;;  %v267_v47 = vsel %vm59_vm1, %v1150_v38, %v263_v42  ;;  %v1176_v55 = vld [vmem:[%s2478_s0 + $0x78] sm:$0x8]   ;;  %v370_v59 = vsel %vm59_vm1, %v1175_v54, %v366_v53 }
  0x16   :  { %v1161_v29 = vld [vmem:[%s2478_s0 + $0xb7] sm:$0x20]   ;;  %v309_v41 = vsel %vm67_vm3, %v1160_v28, %v305_v36  ;;  %v1152_v43 = vld [vmem:[%s2478_s0 + $0x88] sm:$0x10]   ;;  %219 = vrot.lane.b32.xlu0 %v218_v40, %s1369_s30  ;;  %v271_v52 = vsel %vm63_vm2, %v1151_v39, %v267_v47  ;;  %v1177_v56 = vld [vmem:[%s2478_s0 + $0x97] sm:$0x10]   ;;  %v374_v0 = vsel %vm63_vm2, %v1176_v55, %v370_v59 }
  0x17   :  { %v1162_v32 = vld [vmem:[%s2478_s0 + $0xd6] sm:$0x40]   ;;  %v1153_v44 = vld [vmem:[%s2478_s0 + $0xa7] sm:$0x20]   ;;  %v313_v46 = vsel %vm71_vm4, %v1161_v29, %v309_v41  ;;  %v275_v58 = vsel %vm67_vm3, %v1152_v43, %v271_v52  ;;  %v1178_v60 = vld [vmem:[%s2478_s0 + $0xb6] sm:$0x20]   ;;  %v378_v5 = vsel %vm67_vm3, %v1177_v56, %v374_v0 }
  0x18   :  { %v1163_v33 = vld [vmem:[%s2478_s0 + $0xf5] sm:$0x80]   ;;  %v1154_v45 = vld [vmem:[%s2478_s0 + $0xc6] sm:$0x40]   ;;  %v317_v51 = vsel %vm75_vm5, %v1162_v32, %v313_v46  ;;  %v1179_v61 = vld [vmem:[%s2478_s0 + $0xd5] sm:$0x40]   ;;  %v279_v63 = vsel %vm71_vm4, %v1153_v44, %v275_v58  ;;  %v382_v11 = vsel %vm71_vm4, %v1178_v60, %v378_v5 }
  0x19   :  { %v1155_v48 = vld [vmem:[%s2478_s0 + $0xe5] sm:$0x80]   ;;  %v321_v57 = vsel %vm79_vm6, %v1163_v33, %v317_v51  ;;  %v1180_v62 = vld [vmem:[%s2478_s0 + $0xf4] sm:$0x80]   ;;  %s1370_s8 = smov 96   ;;  %v283_v4 = vsel %vm75_vm5, %v1154_v45, %v279_v63  ;;  %v386_v15 = vsel %vm75_vm5, %v1179_v61, %v382_v11  ;;  %s1372_s17 = smov 80  }
  0x1a   :  { %322 = vrot.lane.b32.xlu1 %v321_v57, %s1370_s8  ;;  %v1165_v1 = vld [vmem:[%s2478_s0 + $0xb] sm:$0x1]   ;;  %v287_v10 = vsel %vm79_vm6, %v1155_v48, %v283_v4  ;;  %v1190_v17 = vld [vmem:[%s2478_s0 + $0x1a] sm:$0x1]   ;;  %v390_v20 = vsel %vm79_vm6, %v1180_v62, %v386_v15  ;;  %v1182_v30 = vld [vmem:[%s2478_s0 + $0xa] sm:$0x1]  }
  0x1b   :  { %v1166_v2 = vld [vmem:[%s2478_s0 + $0x2a] sm:$0x2]   ;;  %288 = vrot.lane.b32.xlu0 %v287_v10, %s1370_s8  ;;  %v1191_v18 = vld [vmem:[%s2478_s0 + $0x39] sm:$0x2]   ;;  %s1371_s8 = smov 88   ;;  %s1374_s24 = smov 64  }
  0x1c   :  { %v1167_v3 = vld [vmem:[%s2478_s0 + $0x49] sm:$0x4]   ;;  %v332_v6 = vsel %vm55_vm0, %v1166_v2, %v1165_v1  ;;  %v1192_v19 = vld [vmem:[%s2478_s0 + $0x58] sm:$0x4]   ;;  %v435_v22 = vsel %vm55_vm0, %v1191_v18, %v1190_v17  ;;  %v1183_v33 = vld [vmem:[%s2478_s0 + $0x29] sm:$0x2]  }
  0x1d   :  { %v1168_v7 = vld [vmem:[%s2478_s0 + $0x68] sm:$0x8]   ;;  %v336_v12 = vsel %vm59_vm1, %v1167_v3, %v332_v6  ;;  %v1193_v23 = vld [vmem:[%s2478_s0 + $0x77] sm:$0x8]   ;;  %v439_v27 = vsel %vm59_vm1, %v1192_v19, %v435_v22  ;;  %v1184_v34 = vld [vmem:[%s2478_s0 + $0x48] sm:$0x4]   ;;  %v401_v38 = vsel %vm55_vm0, %v1183_v33, %v1182_v30 }
  0x1e   :  { %v1169_v8 = vld [vmem:[%s2478_s0 + $0x87] sm:$0x10]   ;;  %v340_v16 = vsel %vm63_vm2, %v1168_v7, %v336_v12  ;;  %v1194_v24 = vld [vmem:[%s2478_s0 + $0x96] sm:$0x10]   ;;  %391 = vrot.lane.b32.xlu1 %v390_v20, %s1371_s8  ;;  %v443_v32 = vsel %vm63_vm2, %v1193_v23, %v439_v27  ;;  %v1185_v35 = vld [vmem:[%s2478_s0 + $0x67] sm:$0x8]   ;;  %v405_v43 = vsel %vm59_vm1, %v1184_v34, %v401_v38 }
  0x1f   :  { %v1170_v9 = vld [vmem:[%s2478_s0 + $0xa6] sm:$0x20]   ;;  %v344_v21 = vsel %vm67_vm3, %v1169_v8, %v340_v16  ;;  %v1195_v25 = vld [vmem:[%s2478_s0 + $0xb5] sm:$0x20]   ;;  %v447_v37 = vsel %vm67_vm3, %v1194_v24, %v443_v32  ;;  %v1186_v39 = vld [vmem:[%s2478_s0 + $0x86] sm:$0x10]   ;;  %v409_v48 = vsel %vm63_vm2, %v1185_v35, %v405_v43 }
  0x20   :  { %v1171_v13 = vld [vmem:[%s2478_s0 + $0xc5] sm:$0x40]   ;;  %v348_v26 = vsel %vm71_vm4, %v1170_v9, %v344_v21  ;;  %v1196_v28 = vld [vmem:[%s2478_s0 + $0xd4] sm:$0x40]   ;;  %v1187_v40 = vld [vmem:[%s2478_s0 + $0xa5] sm:$0x20]   ;;  %v451_v42 = vsel %vm71_vm4, %v1195_v25, %v447_v37  ;;  %v413_v54 = vsel %vm67_vm3, %v1186_v39, %v409_v48 }
  0x21   :  { %v1172_v14 = vld [vmem:[%s2478_s0 + $0xe4] sm:$0x80]   ;;  %v1197_v29 = vld [vmem:[%s2478_s0 + $0xf3] sm:$0x80]   ;;  %v352_v31 = vsel %vm75_vm5, %v1171_v13, %v348_v26  ;;  %v1188_v41 = vld [vmem:[%s2478_s0 + $0xc4] sm:$0x40]   ;;  %v455_v47 = vsel %vm75_vm5, %v1196_v28, %v451_v42  ;;  %v417_v59 = vsel %vm71_vm4, %v1187_v40, %v413_v54 }
  0x22   :  { %v356_v36 = vsel %vm79_vm6, %v1172_v14, %v352_v31  ;;  %v1189_v44 = vld [vmem:[%s2478_s0 + $0xe3] sm:$0x80]   ;;  %v1207_v45 = vld [vmem:[%s2478_s0 + $0x19] sm:$0x1]   ;;  %v459_v53 = vsel %vm79_vm6, %v1197_v29, %v455_v47  ;;  %v1199_v61 = vld [vmem:[%s2478_s0 + $0x9] sm:$0x1]   ;;  %v421_v0 = vsel %vm75_vm5, %v1188_v41, %v417_v59 }
  0x23   :  { %357 = vrot.lane.b32.xlu0 %v356_v36, %s1371_s8  ;;  %v1208_v46 = vld [vmem:[%s2478_s0 + $0x38] sm:$0x2]   ;;  %460 = vrot.lane.b32.xlu1 %v459_v53, %s1372_s17  ;;  %v1200_v62 = vld [vmem:[%s2478_s0 + $0x28] sm:$0x2]   ;;  %v425_v6 = vsel %vm79_vm6, %v1189_v44, %v421_v0  ;;  %s1376_s3 = smov 48   ;;  %s1378_s12 = smov 32  }
  0x24   :  { %v504_v49 = vsel %vm55_vm0, %v1208_v46, %v1207_v45  ;;  %v1209_v50 = vld [vmem:[%s2478_s0 + $0x57] sm:$0x4]   ;;  %v1201_v63 = vld [vmem:[%s2478_s0 + $0x47] sm:$0x4]   ;;  %v470_v2 = vsel %vm55_vm0, %v1200_v62, %v1199_v61  ;;  %v1224_v13 = vld [vmem:[%s2478_s0 + $0x18] sm:$0x1]  }
  0x25   :  { %v1210_v51 = vld [vmem:[%s2478_s0 + $0x76] sm:$0x8]   ;;  %v508_v55 = vsel %vm59_vm1, %v1209_v50, %v504_v49  ;;  %v1202_v3 = vld [vmem:[%s2478_s0 + $0x66] sm:$0x8]   ;;  %v474_v8 = vsel %vm59_vm1, %v1201_v63, %v470_v2  ;;  %v1225_v14 = vld [vmem:[%s2478_s0 + $0x37] sm:$0x2]  }
  0x26   :  { %v1211_v52 = vld [vmem:[%s2478_s0 + $0x95] sm:$0x10]   ;;  %v512_v60 = vsel %vm63_vm2, %v1210_v51, %v508_v55  ;;  %v1203_v4 = vld [vmem:[%s2478_s0 + $0x85] sm:$0x10]   ;;  %v478_v12 = vsel %vm63_vm2, %v1202_v3, %v474_v8  ;;  %v1226_v15 = vld [vmem:[%s2478_s0 + $0x56] sm:$0x4]   ;;  %v573_v18 = vsel %vm55_vm0, %v1225_v14, %v1224_v13 }
  0x27   :  { %v1212_v56 = vld [vmem:[%s2478_s0 + $0xb4] sm:$0x20]   ;;  %v516_v1 = vsel %vm67_vm3, %v1211_v52, %v512_v60  ;;  %v1204_v5 = vld [vmem:[%s2478_s0 + $0xa4] sm:$0x20]   ;;  %426 = vrot.lane.b32.xlu0 %v425_v6, %s1372_s17  ;;  %v482_v17 = vsel %vm67_vm3, %v1203_v4, %v478_v12  ;;  %v1227_v19 = vld [vmem:[%s2478_s0 + $0x75] sm:$0x8]   ;;  %v577_v23 = vsel %vm59_vm1, %v1226_v15, %v573_v18 }
  0x28   :  { %v1213_v57 = vld [vmem:[%s2478_s0 + $0xd3] sm:$0x40]   ;;  %v520_v7 = vsel %vm71_vm4, %v1212_v56, %v516_v1  ;;  %v1205_v9 = vld [vmem:[%s2478_s0 + $0xc3] sm:$0x40]   ;;  %v1228_v20 = vld [vmem:[%s2478_s0 + $0x94] sm:$0x10]   ;;  %v486_v22 = vsel %vm71_vm4, %v1204_v5, %v482_v17  ;;  %v581_v28 = vsel %vm63_vm2, %v1227_v19, %v577_v23 }
  0x29   :  { %v1214_v58 = vld [vmem:[%s2478_s0 + $0xf2] sm:$0x80]   ;;  %v1206_v10 = vld [vmem:[%s2478_s0 + $0xe2] sm:$0x80]   ;;  %v524_v11 = vsel %vm75_vm5, %v1213_v57, %v520_v7  ;;  %v1229_v21 = vld [vmem:[%s2478_s0 + $0xb3] sm:$0x20]   ;;  %v490_v27 = vsel %vm75_vm5, %v1205_v9, %v486_v22  ;;  %v585_v33 = vsel %vm67_vm3, %v1228_v20, %v581_v28 }
  0x2a   :  { %v528_v16 = vsel %vm79_vm6, %v1214_v58, %v524_v11  ;;  %s1373_s17 = smov 72   ;;  %v1230_v24 = vld [vmem:[%s2478_s0 + $0xd2] sm:$0x40]   ;;  %v1216_v26 = vld [vmem:[%s2478_s0 + $0x8] sm:$0x1]   ;;  %v494_v32 = vsel %vm79_vm6, %v1206_v10, %v490_v27  ;;  %v589_v38 = vsel %vm71_vm4, %v1229_v21, %v585_v33  ;;  %s1380_s19 = smov 16  }
  0x2b   :  { %529 = vrot.lane.b32.xlu1 %v528_v16, %s1373_s17  ;;  %v1231_v25 = vld [vmem:[%s2478_s0 + $0xf1] sm:$0x80]   ;;  %v1217_v29 = vld [vmem:[%s2478_s0 + $0x27] sm:$0x2]   ;;  %495 = vrot.lane.b32.xlu0 %v494_v32, %s1373_s17  ;;  %v593_v43 = vsel %vm75_vm5, %v1230_v24, %v589_v38  ;;  %s2_s7 = smov 3  ;;  %s4_s8 = smov 12 }
  0x2c   :  { %v1218_v30 = vld [vmem:[%s2478_s0 + $0x46] sm:$0x4]   ;;  %v539_v34 = vsel %vm55_vm0, %v1217_v29, %v1216_v26  ;;  %v1241_v41 = vld [vmem:[%s2478_s0 + $0x17] sm:$0x1]   ;;  %v597_v49 = vsel %vm79_vm6, %v1231_v25, %v593_v43  ;;  %v1233_v57 = vld [vmem:[%s2478_s0 + $0x7] sm:$0x1]  }
  0x2d   :  { %v1219_v31 = vld [vmem:[%s2478_s0 + $0x65] sm:$0x8]   ;;  %v543_v39 = vsel %vm59_vm1, %v1218_v30, %v539_v34  ;;  %v1242_v42 = vld [vmem:[%s2478_s0 + $0x36] sm:$0x2]   ;;  %v1234_v58 = vld [vmem:[%s2478_s0 + $0x26] sm:$0x2]  }
  0x2e   :  { %v1220_v35 = vld [vmem:[%s2478_s0 + $0x84] sm:$0x10]   ;;  %v547_v44 = vsel %vm63_vm2, %v1219_v31, %v543_v39  ;;  %v642_v45 = vsel %vm55_vm0, %v1242_v42, %v1241_v41  ;;  %v1243_v46 = vld [vmem:[%s2478_s0 + $0x55] sm:$0x4]   ;;  %v1235_v59 = vld [vmem:[%s2478_s0 + $0x45] sm:$0x4]   ;;  %v608_v62 = vsel %vm55_vm0, %v1234_v58, %v1233_v57 }
  0x2f   :  { %v1221_v36 = vld [vmem:[%s2478_s0 + $0xa3] sm:$0x20]   ;;  %v1244_v47 = vld [vmem:[%s2478_s0 + $0x74] sm:$0x8]   ;;  %v551_v50 = vsel %vm67_vm3, %v1220_v35, %v547_v44  ;;  %v646_v51 = vsel %vm59_vm1, %v1243_v46, %v642_v45  ;;  %598 = vrot.lane.b32.xlu1 %v597_v49, %s1374_s24  ;;  %v1236_v63 = vld [vmem:[%s2478_s0 + $0x64] sm:$0x8]   ;;  %v612_v4 = vsel %vm59_vm1, %v1235_v59, %v608_v62 }
  0x30   :  { %v1222_v37 = vld [vmem:[%s2478_s0 + $0xc2] sm:$0x40]   ;;  %v1245_v48 = vld [vmem:[%s2478_s0 + $0x93] sm:$0x10]   ;;  %v555_v55 = vsel %vm71_vm4, %v1221_v36, %v551_v50  ;;  %v650_v56 = vsel %vm63_vm2, %v1244_v47, %v646_v51  ;;  %v1237_v0 = vld [vmem:[%s2478_s0 + $0x83] sm:$0x10]   ;;  %v616_v8 = vsel %vm63_vm2, %v1236_v63, %v612_v4 }
  0x31   :  { %v1223_v40 = vld [vmem:[%s2478_s0 + $0xe1] sm:$0x80]   ;;  %v1246_v52 = vld [vmem:[%s2478_s0 + $0xb2] sm:$0x20]   ;;  %v559_v60 = vsel %vm75_vm5, %v1222_v37, %v555_v55  ;;  %v654_v61 = vsel %vm67_vm3, %v1245_v48, %v650_v56  ;;  %v1238_v1 = vld [vmem:[%s2478_s0 + $0xa2] sm:$0x20]   ;;  %v620_v13 = vsel %vm67_vm3, %v1237_v0, %v616_v8 }
  0x32   :  { %v1247_v53 = vld [vmem:[%s2478_s0 + $0xd1] sm:$0x40]   ;;  %v563_v2 = vsel %vm79_vm6, %v1223_v40, %v559_v60  ;;  %v658_v3 = vsel %vm71_vm4, %v1246_v52, %v654_v61  ;;  %v1239_v5 = vld [vmem:[%s2478_s0 + $0xc1] sm:$0x40]   ;;  %v1258_v9 = vld [vmem:[%s2478_s0 + $0x16] sm:$0x1]   ;;  %v624_v18 = vsel %vm71_vm4, %v1238_v1, %v620_v13 }
  0x33   :  { %v1248_v54 = vld [vmem:[%s2478_s0 + $0xf0] sm:$0x80]   ;;  %v1240_v6 = vld [vmem:[%s2478_s0 + $0xe0] sm:$0x80]   ;;  %564 = vrot.lane.b32.xlu0 %v563_v2, %s1374_s24  ;;  %v662_v7 = vsel %vm75_vm5, %v1247_v53, %v658_v3  ;;  %v1259_v10 = vld [vmem:[%s2478_s0 + $0x35] sm:$0x2]   ;;  %v628_v23 = vsel %vm75_vm5, %v1239_v5, %v624_v18 }
  0x34   :  { %v1260_v11 = vld [vmem:[%s2478_s0 + $0x54] sm:$0x4]   ;;  %v666_v12 = vsel %vm79_vm6, %v1248_v54, %v662_v7  ;;  %v711_v14 = vsel %vm55_vm0, %v1259_v10, %v1258_v9  ;;  %s1375_s24 = smov 56   ;;  %v1250_v22 = vld [vmem:[%s2478_s0 + $0x6] sm:$0x1]   ;;  %v632_v28 = vsel %vm79_vm6, %v1240_v6, %v628_v23  ;;  %vm6_vm7 = vcmask 1043458  }
  0x35   :  { %v1261_v15 = vld [vmem:[%s2478_s0 + $0x73] sm:$0x8]   ;;  %667 = vrot.lane.b32.xlu1 %v666_v12, %s1375_s24  ;;  %v715_v19 = vsel %vm59_vm1, %v1260_v11, %v711_v14  ;;  %v1251_v25 = vld [vmem:[%s2478_s0 + $0x25] sm:$0x2]   ;;  %v1275_v37 = vld [vmem:[%s2478_s0 + $0x15] sm:$0x1]  }
  0x36   :  { %v1262_v16 = vld [vmem:[%s2478_s0 + $0x92] sm:$0x10]   ;;  %v719_v24 = vsel %vm63_vm2, %v1261_v15, %v715_v19  ;;  %v1252_v26 = vld [vmem:[%s2478_s0 + $0x44] sm:$0x4]   ;;  %v677_v30 = vsel %vm55_vm0, %v1251_v25, %v1250_v22  ;;  %v1276_v38 = vld [vmem:[%s2478_s0 + $0x34] sm:$0x2]  }
  0x37   :  { %v1263_v17 = vld [vmem:[%s2478_s0 + $0xb1] sm:$0x20]   ;;  %v1253_v27 = vld [vmem:[%s2478_s0 + $0x63] sm:$0x8]   ;;  %v723_v29 = vsel %vm67_vm3, %v1262_v16, %v719_v24  ;;  %633 = vrot.lane.b32.xlu0 %v632_v28, %s1375_s24  ;;  %v681_v35 = vsel %vm59_vm1, %v1252_v26, %v677_v30  ;;  %v780_v41 = vsel %vm55_vm0, %v1276_v38, %v1275_v37  ;;  %v1277_v42 = vld [vmem:[%s2478_s0 + $0x53] sm:$0x4]  }
  0x38   :  { %v1264_v20 = vld [vmem:[%s2478_s0 + $0xd0] sm:$0x40]   ;;  %v1254_v31 = vld [vmem:[%s2478_s0 + $0x82] sm:$0x10]   ;;  %v727_v34 = vsel %vm71_vm4, %v1263_v17, %v723_v29  ;;  %v685_v40 = vsel %vm63_vm2, %v1253_v27, %v681_v35  ;;  %v1278_v43 = vld [vmem:[%s2478_s0 + $0x72] sm:$0x8]   ;;  %v784_v47 = vsel %vm59_vm1, %v1277_v42, %v780_v41 }
  0x39   :  { %v1265_v21 = vld [vmem:[%s2478_s0 + $0xef] sm:$0x80]   ;;  %v1255_v32 = vld [vmem:[%s2478_s0 + $0xa1] sm:$0x20]   ;;  %v731_v39 = vsel %vm75_vm5, %v1264_v20, %v727_v34  ;;  %v1279_v44 = vld [vmem:[%s2478_s0 + $0x91] sm:$0x10]   ;;  %v689_v46 = vsel %vm67_vm3, %v1254_v31, %v685_v40  ;;  %v788_v52 = vsel %vm63_vm2, %v1278_v43, %v784_v47 }
  0x3a   :  { %v1256_v33 = vld [vmem:[%s2478_s0 + $0xc0] sm:$0x40]   ;;  %v735_v45 = vsel %vm79_vm6, %v1265_v21, %v731_v39  ;;  %v1280_v48 = vld [vmem:[%s2478_s0 + $0xb0] sm:$0x20]   ;;  %v693_v51 = vsel %vm71_vm4, %v1255_v32, %v689_v46  ;;  %v1267_v53 = vld [vmem:[%s2478_s0 + $0x5] sm:$0x1]   ;;  %v792_v57 = vsel %vm67_vm3, %v1279_v44, %v788_v52 }
  0x3b   :  { %v1257_v36 = vld [vmem:[%s2478_s0 + $0xdf] sm:$0x80]   ;;  %v1281_v49 = vld [vmem:[%s2478_s0 + $0xcf] sm:$0x40]   ;;  %736 = vrot.lane.b32.xlu1 %v735_v45, %s1376_s3  ;;  %v1268_v54 = vld [vmem:[%s2478_s0 + $0x24] sm:$0x2]   ;;  %v697_v56 = vsel %vm75_vm5, %v1256_v33, %v693_v51  ;;  %v796_v63 = vsel %vm71_vm4, %v1280_v48, %v792_v57 }
  0x3c   :  { %v1282_v50 = vld [vmem:[%s2478_s0 + $0xee] sm:$0x80]   ;;  %v1269_v55 = vld [vmem:[%s2478_s0 + $0x43] sm:$0x4]   ;;  %v746_v58 = vsel %vm55_vm0, %v1268_v54, %v1267_v53  ;;  %v701_v62 = vsel %vm79_vm6, %v1257_v36, %v697_v56  ;;  %v800_v3 = vsel %vm75_vm5, %v1281_v49, %v796_v63  ;;  %v1292_v5 = vld [vmem:[%s2478_s0 + $0x14] sm:$0x1]  }
  0x3d   :  { %v1270_v59 = vld [vmem:[%s2478_s0 + $0x62] sm:$0x8]   ;;  %v750_v0 = vsel %vm59_vm1, %v1269_v55, %v746_v58  ;;  %702 = vrot.lane.b32.xlu0 %v701_v62, %s1376_s3  ;;  %v1293_v6 = vld [vmem:[%s2478_s0 + $0x33] sm:$0x2]   ;;  %v804_v8 = vsel %vm79_vm6, %v1282_v50, %v800_v3  ;;  %s1377_s3 = smov 40   ;;  %s8_s9 = smov 48 }
  0x3e   :  { %v1271_v60 = vld [vmem:[%s2478_s0 + $0x81] sm:$0x10]   ;;  %v754_v4 = vsel %vm63_vm2, %v1270_v59, %v750_v0  ;;  %v1294_v7 = vld [vmem:[%s2478_s0 + $0x52] sm:$0x4]   ;;  %v849_v10 = vsel %vm55_vm0, %v1293_v6, %v1292_v5  ;;  %v1284_v18 = vld [vmem:[%s2478_s0 + $0x4] sm:$0x1]  }
  0x3f   :  { %v1272_v61 = vld [vmem:[%s2478_s0 + $0xa0] sm:$0x20]   ;;  %v758_v9 = vsel %vm67_vm3, %v1271_v60, %v754_v4  ;;  %v1295_v11 = vld [vmem:[%s2478_s0 + $0x71] sm:$0x8]   ;;  %805 = vrot.lane.b32.xlu1 %v804_v8, %s1377_s3  ;;  %v853_v15 = vsel %vm59_vm1, %v1294_v7, %v849_v10  ;;  %v1285_v21 = vld [vmem:[%s2478_s0 + $0x23] sm:$0x2]  }
  0x40   :  { %v1273_v1 = vld [vmem:[%s2478_s0 + $0xbf] sm:$0x40]   ;;  %v1296_v12 = vld [vmem:[%s2478_s0 + $0x90] sm:$0x10]   ;;  %v762_v14 = vsel %vm71_vm4, %v1272_v61, %v758_v9  ;;  %v857_v20 = vsel %vm63_vm2, %v1295_v11, %v853_v15  ;;  %v1286_v22 = vld [vmem:[%s2478_s0 + $0x42] sm:$0x4]   ;;  %v815_v26 = vsel %vm55_vm0, %v1285_v21, %v1284_v18 }
  0x41   :  { %v1274_v2 = vld [vmem:[%s2478_s0 + $0xde] sm:$0x80]   ;;  %v1297_v13 = vld [vmem:[%s2478_s0 + $0xaf] sm:$0x20]   ;;  %v766_v19 = vsel %vm75_vm5, %v1273_v1, %v762_v14  ;;  %v1287_v23 = vld [vmem:[%s2478_s0 + $0x61] sm:$0x8]   ;;  %v861_v25 = vsel %vm67_vm3, %v1296_v12, %v857_v20  ;;  %v819_v31 = vsel %vm59_vm1, %v1286_v22, %v815_v26 }
  0x42   :  { %v1298_v16 = vld [vmem:[%s2478_s0 + $0xce] sm:$0x40]   ;;  %v770_v24 = vsel %vm79_vm6, %v1274_v2, %v766_v19  ;;  %v1288_v27 = vld [vmem:[%s2478_s0 + $0x80] sm:$0x10]   ;;  %v865_v30 = vsel %vm71_vm4, %v1297_v13, %v861_v25  ;;  %v1309_v33 = vld [vmem:[%s2478_s0 + $0x13] sm:$0x1]   ;;  %v823_v36 = vsel %vm63_vm2, %v1287_v23, %v819_v31 }
  0x43   :  { %v1299_v17 = vld [vmem:[%s2478_s0 + $0xed] sm:$0x80]   ;;  %v1289_v28 = vld [vmem:[%s2478_s0 + $0x9f] sm:$0x20]   ;;  %771 = vrot.lane.b32.xlu0 %v770_v24, %s1377_s3  ;;  %v1310_v34 = vld [vmem:[%s2478_s0 + $0x32] sm:$0x2]   ;;  %v869_v35 = vsel %vm75_vm5, %v1298_v16, %v865_v30  ;;  %v827_v42 = vsel %vm67_vm3, %v1288_v27, %v823_v36 }
  0x44   :  { %v1290_v29 = vld [vmem:[%s2478_s0 + $0xbe] sm:$0x40]   ;;  %v918_v37 = vsel %vm55_vm0, %v1310_v34, %v1309_v33  ;;  %v1311_v38 = vld [vmem:[%s2478_s0 + $0x51] sm:$0x4]   ;;  %v873_v41 = vsel %vm79_vm6, %v1299_v17, %v869_v35  ;;  %v831_v47 = vsel %vm71_vm4, %v1289_v28, %v827_v42  ;;  %v1301_v49 = vld [vmem:[%s2478_s0 + $0x3] sm:$0x1]  }
  0x45   :  { %v1291_v32 = vld [vmem:[%s2478_s0 + $0xdd] sm:$0x80]   ;;  %v1312_v39 = vld [vmem:[%s2478_s0 + $0x70] sm:$0x8]   ;;  %v922_v43 = vsel %vm59_vm1, %v1311_v38, %v918_v37  ;;  %874 = vrot.lane.b32.xlu1 %v873_v41, %s1378_s12  ;;  %v1302_v50 = vld [vmem:[%s2478_s0 + $0x22] sm:$0x2]   ;;  %v835_v52 = vsel %vm75_vm5, %v1290_v29, %v831_v47 }
  0x46   :  { %v1313_v40 = vld [vmem:[%s2478_s0 + $0x8f] sm:$0x10]   ;;  %v926_v48 = vsel %vm63_vm2, %v1312_v39, %v922_v43  ;;  %v1303_v51 = vld [vmem:[%s2478_s0 + $0x41] sm:$0x4]   ;;  %v884_v54 = vsel %vm55_vm0, %v1302_v50, %v1301_v49  ;;  %v839_v58 = vsel %vm79_vm6, %v1291_v32, %v835_v52  ;;  %v1326_v1 = vld [vmem:[%s2478_s0 + $0x12] sm:$0x1]  }
  0x47   :  { %v1314_v44 = vld [vmem:[%s2478_s0 + $0xae] sm:$0x20]   ;;  %v930_v53 = vsel %vm67_vm3, %v1313_v40, %v926_v48  ;;  %v1304_v55 = vld [vmem:[%s2478_s0 + $0x60] sm:$0x8]   ;;  %v888_v60 = vsel %vm59_vm1, %v1303_v51, %v884_v54  ;;  %840 = vrot.lane.b32.xlu0 %v839_v58, %s1378_s12  ;;  %v1327_v2 = vld [vmem:[%s2478_s0 + $0x31] sm:$0x2]  }
  0x48   :  { %v1315_v45 = vld [vmem:[%s2478_s0 + $0xcd] sm:$0x40]   ;;  %v1305_v56 = vld [vmem:[%s2478_s0 + $0x7f] sm:$0x10]   ;;  %v934_v59 = vsel %vm71_vm4, %v1314_v44, %v930_v53  ;;  %v892_v0 = vsel %vm63_vm2, %v1304_v55, %v888_v60  ;;  %v1328_v3 = vld [vmem:[%s2478_s0 + $0x50] sm:$0x4]   ;;  %v987_v6 = vsel %vm55_vm0, %v1327_v2, %v1326_v1 }
  0x49   :  { %v1316_v46 = vld [vmem:[%s2478_s0 + $0xec] sm:$0x80]   ;;  %v1306_v57 = vld [vmem:[%s2478_s0 + $0x9e] sm:$0x20]   ;;  %v938_v63 = vsel %vm75_vm5, %v1315_v45, %v934_v59  ;;  %v896_v5 = vsel %vm67_vm3, %v1305_v56, %v892_v0  ;;  %v1329_v7 = vld [vmem:[%s2478_s0 + $0x6f] sm:$0x8]   ;;  %v991_v11 = vsel %vm59_vm1, %v1328_v3, %v987_v6 }
  0x4a   :  { %v1307_v61 = vld [vmem:[%s2478_s0 + $0xbd] sm:$0x40]   ;;  %v942_v4 = vsel %vm79_vm6, %v1316_v46, %v938_v63  ;;  %v1330_v8 = vld [vmem:[%s2478_s0 + $0x8e] sm:$0x10]   ;;  %s1379_s12 = smov 24   ;;  %v900_v10 = vsel %vm71_vm4, %v1306_v57, %v896_v5  ;;  %v995_v16 = vsel %vm63_vm2, %v1329_v7, %v991_v11  ;;  %vm10_vm8 = vcmask 1045508  }
  0x4b   :  { %v1308_v62 = vld [vmem:[%s2478_s0 + $0xdc] sm:$0x80]   ;;  %v1331_v9 = vld [vmem:[%s2478_s0 + $0xad] sm:$0x20]   ;;  %943 = vrot.lane.b32.xlu1 %v942_v4, %s1379_s12  ;;  %v1318_v14 = vld [vmem:[%s2478_s0 + $0x2] sm:$0x1]   ;;  %v904_v15 = vsel %vm75_vm5, %v1307_v61, %v900_v10  ;;  %v999_v21 = vsel %vm67_vm3, %v1330_v8, %v995_v16 }
  0x4c   :  { %v1332_v12 = vld [vmem:[%s2478_s0 + $0xcc] sm:$0x40]   ;;  %v1319_v17 = vld [vmem:[%s2478_s0 + $0x21] sm:$0x2]   ;;  %v908_v20 = vsel %vm79_vm6, %v1308_v62, %v904_v15  ;;  %v1003_v26 = vsel %vm71_vm4, %v1331_v9, %v999_v21  ;;  %v1343_v29 = vld [vmem:[%s2478_s0 + $0x11] sm:$0x1]  }
  0x4d   :  { %v1333_v13 = vld [vmem:[%s2478_s0 + $0xeb] sm:$0x80]   ;;  %v1320_v18 = vld [vmem:[%s2478_s0 + $0x40] sm:$0x4]   ;;  %v953_v22 = vsel %vm55_vm0, %v1319_v17, %v1318_v14  ;;  %909 = vrot.lane.b32.xlu0 %v908_v20, %s1379_s12  ;;  %v1344_v30 = vld [vmem:[%s2478_s0 + $0x30] sm:$0x2]   ;;  %v1007_v31 = vsel %vm75_vm5, %v1332_v12, %v1003_v26 }
  0x4e   :  { %v1321_v19 = vld [vmem:[%s2478_s0 + $0x5f] sm:$0x8]   ;;  %v957_v27 = vsel %vm59_vm1, %v1320_v18, %v953_v22  ;;  %v1056_v33 = vsel %vm55_vm0, %v1344_v30, %v1343_v29  ;;  %v1345_v34 = vld [vmem:[%s2478_s0 + $0x4f] sm:$0x4]   ;;  %v1011_v37 = vsel %vm79_vm6, %v1333_v13, %v1007_v31  ;;  %v1335_v45 = vld [vmem:[%s2478_s0 + $0x1] sm:$0x1]  }
  0x4f   :  { %v1322_v23 = vld [vmem:[%s2478_s0 + $0x7e] sm:$0x10]   ;;  %v961_v32 = vsel %vm63_vm2, %v1321_v19, %v957_v27  ;;  %v1346_v35 = vld [vmem:[%s2478_s0 + $0x6e] sm:$0x8]   ;;  %v1060_v39 = vsel %vm59_vm1, %v1345_v34, %v1056_v33  ;;  %1012 = vrot.lane.b32.xlu1 %v1011_v37, %s1380_s19  ;;  %v1336_v46 = vld [vmem:[%s2478_s0 + $0x20] sm:$0x2]  }
  0x50   :  { %v1323_v24 = vld [vmem:[%s2478_s0 + $0x9d] sm:$0x20]   ;;  %v1347_v36 = vld [vmem:[%s2478_s0 + $0x8d] sm:$0x10]   ;;  %v965_v38 = vsel %vm67_vm3, %v1322_v23, %v961_v32  ;;  %v1064_v44 = vsel %vm63_vm2, %v1346_v35, %v1060_v39  ;;  %v1337_v47 = vld [vmem:[%s2478_s0 + $0x3f] sm:$0x4]   ;;  %v1022_v50 = vsel %vm55_vm0, %v1336_v46, %v1335_v45 }
  0x51   :  { %v1324_v25 = vld [vmem:[%s2478_s0 + $0xbc] sm:$0x40]   ;;  %v1348_v40 = vld [vmem:[%s2478_s0 + $0xac] sm:$0x20]   ;;  %v969_v43 = vsel %vm71_vm4, %v1323_v24, %v965_v38  ;;  %v1068_v49 = vsel %vm67_vm3, %v1347_v36, %v1064_v44  ;;  %v1338_v51 = vld [vmem:[%s2478_s0 + $0x5e] sm:$0x8]   ;;  %v1026_v56 = vsel %vm59_vm1, %v1337_v47, %v1022_v50 }
  0x52   :  { %v1325_v28 = vld [vmem:[%s2478_s0 + $0xdb] sm:$0x80]   ;;  %v1349_v41 = vld [vmem:[%s2478_s0 + $0xcb] sm:$0x40]   ;;  %v973_v48 = vsel %vm75_vm5, %v1324_v25, %v969_v43  ;;  %v1339_v52 = vld [vmem:[%s2478_s0 + $0x7d] sm:$0x10]   ;;  %v1072_v55 = vsel %vm71_vm4, %v1348_v40, %v1068_v49  ;;  %v1030_v60 = vsel %vm63_vm2, %v1338_v51, %v1026_v56 }
  0x53   :  { %v1350_v42 = vld [vmem:[%s2478_s0 + $0xea] sm:$0x80]   ;;  %v1340_v53 = vld [vmem:[%s2478_s0 + $0x9c] sm:$0x20]   ;;  %v977_v54 = vsel %vm79_vm6, %v1325_v28, %v973_v48  ;;  %v1076_v59 = vsel %vm75_vm5, %v1349_v41, %v1072_v55  ;;  %s12_s10 = smov 192  ;;  %v1034_v63 = vsel %vm67_vm3, %v1339_v52, %v1030_v60  ;;  %vm14_vm9 = vcmask 1047558  }
  0x54   :  { %v1341_v57 = vld [vmem:[%s2478_s0 + $0xbb] sm:$0x40]   ;;  %978 = vrot.lane.b32.xlu0 %v977_v54, %s1380_s19  ;;  %v3_v61 = vld [vmem:[%s2478_s0] ss:$16 sm:%s2_s7]   ;;  %v1080_v62 = vsel %vm79_vm6, %v1350_v42, %v1076_v59  ;;  %s25_s14 = smov 3  ;;  %s28_s15 = smov 12  ;;  %v1038_v1 = vsel %vm71_vm4, %v1340_v53, %v1034_v63 }
  0x55   :  { %v1342_v58 = vld [vmem:[%s2478_s0 + $0xda] sm:$0x80]   ;;  %v5_v0 = vld [vmem:[%s2478_s0] ss:$16 sm:%s4_s8]   ;;  %s1381_s11 = smov 8   ;;  %vm16_vm10 = vcmask 64512   ;;  %v1042_v4 = vsel %vm75_vm5, %v1341_v57, %v1038_v1 }
  0x56   :  { %1081 = vrot.lane.b32.xlu1 %v1080_v62, %s1381_s11  ;;  %s33_s18 = smov 48  ;;  %s38_s19 = smov 192  ;;  %v7_v2 = vsel %vm6_vm7, %v5_v0, %v3_v61  ;;  %v9_v3 = vld [vmem:[%s2478_s0] ss:$16 sm:%s8_s9]   ;;  %v1046_v8 = vsel %vm79_vm6, %v1342_v58, %v1042_v4  ;;  %vm83_vm11 = vcmask 1048512   ;;  %vm152_vm12 = vcmask 982912  }
  0x57   :  { %v11_v5 = vsel %vm10_vm8, %v9_v3, %v7_v2  ;;  %v13_v6 = vld [vmem:[%s2478_s0] ss:$16 sm:%s12_s10]   ;;  %vm221_vm13 = vcmask 917312   ;;  %vm290_vm14 = vcmask 851712   ;;  %vm359_vm15 = vcmask 786112  }
  0x58   :  { %v1089_v7 = vld [vmem:[%s2478_s0 + $0x80] ss:$16 sm:%s25_s14]   ;;  %v15_v9 = vsel %vm14_vm9, %v13_v6, %v11_v5  ;;  %1047 = vrot.lane.b32.xlu0 %v1046_v8, %s1381_s11  ;;  %vm428_vm0 = vcmask 720512   ;;  %vm497_vm1 = vcmask 654912   ;;  %vm566_vm2 = vcmask 589312  }
  0x59   :  { %v1090_v10 = vld [vmem:[%s2478_s0 + $0x80] ss:$16 sm:%s28_s15]   ;;  %17 = vst.msk [vmem:[%s2479_s1] ss:$8 sm:$0x3] %vm16_vm10, %v15_v9   ;;  %vm635_vm3 = vcmask 523712  }
  0x5a   :  { %v1091_v11 = vld [vmem:[%s2478_s0 + $0x80] ss:$16 sm:%s33_s18]   ;;  %1086 = vst.msk [vmem:[%s2479_s1 - $0xf] ss:$8 sm:$0xc] %vm16_vm10, %v15_v9   ;;  %v31_v12 = vsel %vm6_vm7, %v1090_v10, %v1089_v7  ;;  %vm704_vm4 = vcmask 458112  }
  0x5b   :  { %1087 = vst.msk [vmem:[%s2479_s1 - $0x1e] ss:$8 sm:$0x30] %vm16_vm10, %v15_v9   ;;  %1088 = vst.msk [vmem:[%s2479_s1 - $0x2d] ss:$8 sm:$0xc0] %vm16_vm10, %v15_v9   ;;  %v36_v14 = vsel %vm10_vm8, %v1091_v11, %v31_v12 }
  0x5c   :  { %v1092_v13 = vld [vmem:[%s2478_s0 + $0x80] ss:$16 sm:%s38_s19]   ;;  %vm773_vm5 = vcmask 392512   ;;  %vm842_vm6 = vcmask 326912   ;;  %vm911_vm7 = vcmask 261312   ;;  %vm980_vm8 = vcmask 195712  }
  0x5d   :  { %v41_v15 = vsel %vm14_vm9, %v1092_v13, %v36_v14  ;;  %vm1049_vm9 = vcmask 130112  }
  0x5e   :  { %1093 = vst.msk [vmem:[%s2479_s1 + $0x4] ss:$8 sm:$0x3] %vm16_vm10, %v41_v15   ;;  %1094 = vst.msk [vmem:[%s2479_s1 - $0xb] ss:$8 sm:$0xc] %vm16_vm10, %v41_v15  }
  0x5f   :  { %1095 = vst.msk [vmem:[%s2479_s1 - $0x1a] ss:$8 sm:$0x30] %vm16_vm10, %v41_v15   ;;  %1096 = vst.msk [vmem:[%s2479_s1 - $0x29] ss:$8 sm:$0xc0] %vm16_vm10, %v41_v15  }
  0x7c   :  { %v151_v16 = vpop.permute.xlu1 %150  }
  0x7d   :  { %v82_v17 = vpop.permute.xlu0 %81  }
  0x7e   :  { %84 = vst.msk [vmem:[%s2479_s1] sm:$0xff] %vm83_vm11, %v82_v17  }
  0x7f   :  { %153 = vst.msk [vmem:[%s2479_s1] sm:$0xff] %vm152_vm12, %v151_v16  }
  0x80   :  { %v185_v18 = vpop.permute.xlu1 %184  }
  0x84   :  { %v116_v19 = vpop.permute.xlu0 %115  }
  0x85   :  { %1113 = vst.msk [vmem:[%s2479_s1 + $0x8] sm:$0xff] %vm83_vm11, %v116_v19   ;;  %v254_v20 = vpop.permute.xlu1 %253  }
  0x86   :  { %1130 = vst.msk [vmem:[%s2479_s1 + $0x8] sm:$0xff] %vm152_vm12, %v185_v18  }
  0x87   :  { %1147 = vst.msk [vmem:[%s2479_s1 + $0x8] sm:$0xff] %vm221_vm13, %v254_v20  }
  0x88   :  { %v220_v21 = vpop.permute.xlu0 %219  }
  0x89   :  { %222 = vst.msk [vmem:[%s2479_s1] sm:$0xff] %vm221_vm13, %v220_v21  }
  0x8c   :  { %v323_v22 = vpop.permute.xlu1 %322  }
  0x8d   :  { %1164 = vst.msk [vmem:[%s2479_s1 + $0x8] sm:$0xff] %vm290_vm14, %v323_v22   ;;  %v289_v23 = vpop.permute.xlu0 %288  }
  0x8e   :  { %291 = vst.msk [vmem:[%s2479_s1] sm:$0xff] %vm290_vm14, %v289_v23  }
  0x90   :  { %v392_v24 = vpop.permute.xlu1 %391  }
  0x91   :  { %1181 = vst.msk [vmem:[%s2479_s1 + $0x8] sm:$0xff] %vm359_vm15, %v392_v24  }
  0x95   :  { %v358_v25 = vpop.permute.xlu0 %357   ;;  %v461_v26 = vpop.permute.xlu1 %460  }
  0x96   :  { %360 = vst.msk [vmem:[%s2479_s1] sm:$0xff] %vm359_vm15, %v358_v25  }
  0x97   :  { %1198 = vst.msk [vmem:[%s2479_s1 + $0x8] sm:$0xff] %vm428_vm0, %v461_v26  }
  0x99   :  { %v427_v27 = vpop.permute.xlu0 %426  }
  0x9a   :  { %429 = vst.msk [vmem:[%s2479_s1] sm:$0xff] %vm428_vm0, %v427_v27  }
  0x9d   :  { %v530_v28 = vpop.permute.xlu1 %529   ;;  %v496_v29 = vpop.permute.xlu0 %495  }
  0x9e   :  { %1215 = vst.msk [vmem:[%s2479_s1 + $0x8] sm:$0xff] %vm497_vm1, %v530_v28   ;;  %498 = vst.msk [vmem:[%s2479_s1] sm:$0xff] %vm497_vm1, %v496_v29  }
  0xa1   :  { %v599_v30 = vpop.permute.xlu1 %598  }
  0xa2   :  { %1232 = vst.msk [vmem:[%s2479_s1 + $0x8] sm:$0xff] %vm566_vm2, %v599_v30  }
  0xa5   :  { %v565_v31 = vpop.permute.xlu0 %564  }
  0xa6   :  { %567 = vst.msk [vmem:[%s2479_s1] sm:$0xff] %vm566_vm2, %v565_v31  }
  0xa7   :  { %v668_v32 = vpop.permute.xlu1 %667  }
  0xa8   :  { %1249 = vst.msk [vmem:[%s2479_s1 + $0x8] sm:$0xff] %vm635_vm3, %v668_v32  }
  0xa9   :  { %v634_v33 = vpop.permute.xlu0 %633  }
  0xaa   :  { %636 = vst.msk [vmem:[%s2479_s1] sm:$0xff] %vm635_vm3, %v634_v33  }
  0xad   :  { %v737_v34 = vpop.permute.xlu1 %736  }
  0xae   :  { %1266 = vst.msk [vmem:[%s2479_s1 + $0x8] sm:$0xff] %vm704_vm4, %v737_v34  }
  0xaf   :  { %v703_v35 = vpop.permute.xlu0 %702  }
  0xb0   :  { %705 = vst.msk [vmem:[%s2479_s1] sm:$0xff] %vm704_vm4, %v703_v35  }
  0xb1   :  { %v806_v36 = vpop.permute.xlu1 %805  }
  0xb2   :  { %1283 = vst.msk [vmem:[%s2479_s1 + $0x8] sm:$0xff] %vm773_vm5, %v806_v36  }
  0xb5   :  { %v772_v37 = vpop.permute.xlu0 %771  }
  0xb6   :  { %774 = vst.msk [vmem:[%s2479_s1] sm:$0xff] %vm773_vm5, %v772_v37  }
  0xb7   :  { %v875_v38 = vpop.permute.xlu1 %874  }
  0xb8   :  { %1300 = vst.msk [vmem:[%s2479_s1 + $0x8] sm:$0xff] %vm842_vm6, %v875_v38  }
  0xb9   :  { %v841_v39 = vpop.permute.xlu0 %840  }
  0xba   :  { %843 = vst.msk [vmem:[%s2479_s1] sm:$0xff] %vm842_vm6, %v841_v39  }
  0xbd   :  { %v944_v40 = vpop.permute.xlu1 %943  }
  0xbe   :  { %1317 = vst.msk [vmem:[%s2479_s1 + $0x8] sm:$0xff] %vm911_vm7, %v944_v40  }
  0xbf   :  { %v910_v41 = vpop.permute.xlu0 %909  }
  0xc0   :  { %912 = vst.msk [vmem:[%s2479_s1] sm:$0xff] %vm911_vm7, %v910_v41  }
  0xc1   :  { %v1013_v42 = vpop.permute.xlu1 %1012  }
  0xc2   :  { %1334 = vst.msk [vmem:[%s2479_s1 + $0x8] sm:$0xff] %vm980_vm8, %v1013_v42  }
  0xc6   :  { %v979_v43 = vpop.permute.xlu0 %978  }
  0xc7   :  { %981 = vst.msk [vmem:[%s2479_s1] sm:$0xff] %vm980_vm8, %v979_v43  }
  0xc8   :  { %v1082_v44 = vpop.permute.xlu1 %1081  }
  0xc9   :  { %1351 = vst.msk [vmem:[%s2479_s1 + $0x8] sm:$0xff] %vm1049_vm9, %v1082_v44  }
  0xca   :  { %v1048_v45 = vpop.permute.xlu0 %1047  }
  0xcb   :  { %1050 = vst.msk [vmem:[%s2479_s1] sm:$0xff] %vm1049_vm9, %v1048_v45  }

// kernel: up_conv_forward.1
= control target key start
LH: loop header
LB: loop body
LE: loop exit
PB: predicated region body
PF: predicated region fallthrough
CT: control target
= control target key end

     0   :  { %v2531_v3 = vmov 0.0   ;;  %vm1007_vm0 = vcmask 64512   ;;  %s2523_s1 = inlined_call_operand.vmem [shape: f32[3,128,256], index: 1, kind: input, shape index: {}]   ;;  %s2524_s0 = inlined_call_operand.vmem [shape: f32[68,128], index: 0, kind: input, shape index: {}]   ;;  %s2525_s5 = inlined_call_operand.vmem [shape: f32[256,8], index: 5, kind: input, shape index: {}]   ;;  %s2526_s2 = inlined_call_operand.vmem [shape: f32[1,256], index: 2, kind: input, shape index: {}]   ;;  %s2527_s6 = inlined_call_operand.vmem [shape: f32[8,256], index: 6, kind: input, shape index: {}]   ;;  %s2528_s3 = inlined_call_operand.vmem [shape: f32[1,8], index: 3, kind: input, shape index: {}]   ;;  %s2529_s4 = inlined_call_operand.vmem [shape: f32[1,8], index: 4, kind: input, shape index: {}]   ;;  %s2530_s7 = inlined_call_operand.vmem [shape: f32[64,256], index: 7, kind: output, shape index: {}]  }
   0x1   :  { %v1455_v0 = vld [vmem:[%s2523_s1 + $0x1f8] sm:$0xff]  ;;  %v1465_v2 = vld [vmem:[%s2523_s1 + $0x1f0] sm:$0xff]  ;;  %163 = vmatprep.mubr.f32.mxu0 %v2531_v3  ;;  %252 = vmatprep.mubr.f32.mxu1 %v2531_v3  ;;  %v1479_v5 = vld [vmem:[%s2523_s1 + $0x1e8] sm:$0xff] }
   0x2   :  { %v1460_v1 = vld [vmem:[%s2523_s1 + $0xf8] sm:$0xff]  ;;  %99 = vmatprep.subr.mxu0 %v1455_v0  ;;  %v1474_v4 = vld [vmem:[%s2523_s1 + $0xf0] sm:$0xff]  ;;  %v1484_v6 = vld [vmem:[%s2523_s1 + $0xe8] sm:$0xff] }
   0x3   :  { %188 = vmatprep.subr.mxu1 %v1460_v1  ;;  %100 = vmatpush1.msra.mxu0 %v1465_v2  ;;  %v1491_v7 = vld [vmem:[%s2523_s1 + $0x1e0] sm:$0xff]  ;;  %v1501_v9 = vld [vmem:[%s2523_s1 + $0x1d8] sm:$0xff]  ;;  %v1513_v11 = vld [vmem:[%s2523_s1 + $0x1d0] sm:$0xff] }
   0x4   :  { %189 = vmatpush1.msra.mxu1 %v1474_v4  ;;  %v1496_v8 = vld [vmem:[%s2523_s1 + $0xe0] sm:$0xff]  ;;  %101 = vmatprep.subr.mxu0 %v1479_v5  ;;  %v1508_v10 = vld [vmem:[%s2523_s1 + $0xd8] sm:$0xff]  ;;  %v1518_v12 = vld [vmem:[%s2523_s1 + $0xd0] sm:$0xff] }
   0x5   :  { %190 = vmatprep.subr.mxu1 %v1484_v6  ;;  %102 = vmatpush1.msra.mxu0 %v1491_v7  ;;  %v1525_v13 = vld [vmem:[%s2523_s1 + $0x1c8] sm:$0xff]  ;;  %v1537_v15 = vld [vmem:[%s2523_s1 + $0x1c0] sm:$0xff]  ;;  %v1549_v17 = vld [vmem:[%s2523_s1 + $0x1b8] sm:$0xff] }
   0x6   :  { %191 = vmatpush1.msra.mxu1 %v1496_v8  ;;  %v1530_v14 = vld [vmem:[%s2523_s1 + $0xc8] sm:$0xff]  ;;  %103 = vmatprep.subr.mxu0 %v1501_v9  ;;  %v1542_v16 = vld [vmem:[%s2523_s1 + $0xc0] sm:$0xff]  ;;  %v1554_v18 = vld [vmem:[%s2523_s1 + $0xb8] sm:$0xff] }
   0x7   :  { %192 = vmatprep.subr.mxu1 %v1508_v10  ;;  %104 = vmatpush1.msra.mxu0 %v1513_v11  ;;  %v1561_v19 = vld [vmem:[%s2523_s1 + $0x1b0] sm:$0xff]  ;;  %v1573_v21 = vld [vmem:[%s2523_s1 + $0x1a8] sm:$0xff]  ;;  %v1585_v23 = vld [vmem:[%s2523_s1 + $0x1a0] sm:$0xff] }
   0x8   :  { %193 = vmatpush1.msra.mxu1 %v1518_v12  ;;  %105 = vmatprep.subr.mxu0 %v1525_v13  ;;  %v1566_v20 = vld [vmem:[%s2523_s1 + $0xb0] sm:$0xff]  ;;  %v1578_v22 = vld [vmem:[%s2523_s1 + $0xa8] sm:$0xff]  ;;  %v1590_v24 = vld [vmem:[%s2523_s1 + $0xa0] sm:$0xff] }
   0x9   :  { %194 = vmatprep.subr.mxu1 %v1530_v14  ;;  %106 = vmatpush1.msra.mxu0 %v1537_v15  ;;  %v1597_v25 = vld [vmem:[%s2523_s1 + $0x198] sm:$0xff]  ;;  %v1609_v27 = vld [vmem:[%s2523_s1 + $0x190] sm:$0xff]  ;;  %v1621_v29 = vld [vmem:[%s2523_s1 + $0x188] sm:$0xff] }
   0xa   :  { %195 = vmatpush1.msra.mxu1 %v1542_v16  ;;  %107 = vmatprep.subr.mxu0 %v1549_v17  ;;  %v1602_v26 = vld [vmem:[%s2523_s1 + $0x98] sm:$0xff]  ;;  %v1614_v28 = vld [vmem:[%s2523_s1 + $0x90] sm:$0xff]  ;;  %v1626_v30 = vld [vmem:[%s2523_s1 + $0x88] sm:$0xff] }
   0xb   :  { %196 = vmatprep.subr.mxu1 %v1554_v18  ;;  %108 = vmatpush1.msra.mxu0 %v1561_v19  ;;  %v1633_v31 = vld [vmem:[%s2523_s1 + $0x180] sm:$0xff]  ;;  %v1645_v33 = vld [vmem:[%s2523_s1 + $0x178] sm:$0xff]  ;;  %v1657_v35 = vld [vmem:[%s2523_s1 + $0x170] sm:$0xff] }
   0xc   :  { %197 = vmatpush1.msra.mxu1 %v1566_v20  ;;  %109 = vmatprep.subr.mxu0 %v1573_v21  ;;  %v1638_v32 = vld [vmem:[%s2523_s1 + $0x80] sm:$0xff]  ;;  %v1650_v34 = vld [vmem:[%s2523_s1 + $0x78] sm:$0xff]  ;;  %v1662_v36 = vld [vmem:[%s2523_s1 + $0x70] sm:$0xff] }
   0xd   :  { %198 = vmatprep.subr.mxu1 %v1578_v22  ;;  %110 = vmatpush1.msra.mxu0 %v1585_v23  ;;  %v1669_v37 = vld [vmem:[%s2523_s1 + $0x168] sm:$0xff]  ;;  %v1681_v39 = vld [vmem:[%s2523_s1 + $0x160] sm:$0xff]  ;;  %v1693_v41 = vld [vmem:[%s2523_s1 + $0x158] sm:$0xff] }
   0xe   :  { %199 = vmatpush1.msra.mxu1 %v1590_v24  ;;  %111 = vmatprep.subr.mxu0 %v1597_v25  ;;  %v1674_v38 = vld [vmem:[%s2523_s1 + $0x68] sm:$0xff]  ;;  %v1686_v40 = vld [vmem:[%s2523_s1 + $0x60] sm:$0xff]  ;;  %v1698_v42 = vld [vmem:[%s2523_s1 + $0x58] sm:$0xff] }
   0xf   :  { %200 = vmatprep.subr.mxu1 %v1602_v26  ;;  %112 = vmatpush1.msra.mxu0 %v1609_v27  ;;  %v1705_v43 = vld [vmem:[%s2523_s1 + $0x150] sm:$0xff]  ;;  %v1717_v45 = vld [vmem:[%s2523_s1 + $0x148] sm:$0xff]  ;;  %v1729_v47 = vld [vmem:[%s2523_s1 + $0x140] sm:$0xff] }
  0x10   :  { %201 = vmatpush1.msra.mxu1 %v1614_v28  ;;  %113 = vmatprep.subr.mxu0 %v1621_v29  ;;  %v1710_v44 = vld [vmem:[%s2523_s1 + $0x50] sm:$0xff]  ;;  %v1722_v46 = vld [vmem:[%s2523_s1 + $0x48] sm:$0xff]  ;;  %v1734_v48 = vld [vmem:[%s2523_s1 + $0x40] sm:$0xff] }
  0x11   :  { %202 = vmatprep.subr.mxu1 %v1626_v30  ;;  %114 = vmatpush1.msra.mxu0 %v1633_v31  ;;  %v1741_v49 = vld [vmem:[%s2523_s1 + $0x138] sm:$0xff]  ;;  %v1753_v51 = vld [vmem:[%s2523_s1 + $0x130] sm:$0xff]  ;;  %v1765_v53 = vld [vmem:[%s2523_s1 + $0x128] sm:$0xff] }
  0x12   :  { %203 = vmatpush1.msra.mxu1 %v1638_v32  ;;  %115 = vmatprep.subr.mxu0 %v1645_v33  ;;  %v1746_v50 = vld [vmem:[%s2523_s1 + $0x38] sm:$0xff]  ;;  %v1758_v52 = vld [vmem:[%s2523_s1 + $0x30] sm:$0xff]  ;;  %v1770_v54 = vld [vmem:[%s2523_s1 + $0x28] sm:$0xff] }
  0x13   :  { %204 = vmatprep.subr.mxu1 %v1650_v34  ;;  %116 = vmatpush1.msra.mxu0 %v1657_v35  ;;  %2540 = vst [vmem:[#allocation2_spill] sm:$0xff] %v1758_v52  ;;  %2541 = vst [vmem:[#allocation3_spill] sm:$0xff] %v1770_v54  ;;  %v1777_v55 = vld [vmem:[%s2523_s1 + $0x120] sm:$0xff]  ;;  %v1789_v57 = vld [vmem:[%s2523_s1 + $0x118] sm:$0xff] }
  0x14   :  { %205 = vmatpush1.msra.mxu1 %v1662_v36  ;;  %117 = vmatprep.subr.mxu0 %v1669_v37  ;;  %v1782_v56 = vld [vmem:[%s2523_s1 + $0x20] sm:$0xff]  ;;  %v1794_v58 = vld [vmem:[%s2523_s1 + $0x18] sm:$0xff]  ;;  %v1801_v59 = vld [vmem:[%s2523_s1 + $0x110] sm:$0xff] }
  0x15   :  { %206 = vmatprep.subr.mxu1 %v1674_v38  ;;  %118 = vmatpush1.msra.mxu0 %v1681_v39  ;;  %2542 = vst [vmem:[#allocation4_spill] sm:$0xff] %v1782_v56  ;;  %2543 = vst [vmem:[#allocation5_spill] sm:$0xff] %v1794_v58  ;;  %v1806_v60 = vld [vmem:[%s2523_s1 + $0x10] sm:$0xff]  ;;  %v1813_v61 = vld [vmem:[%s2523_s1 + $0x108] sm:$0xff] }
  0x16   :  { %207 = vmatpush1.msra.mxu1 %v1686_v40  ;;  %119 = vmatprep.subr.mxu0 %v1693_v41  ;;  %2544 = vst [vmem:[#allocation6_spill] sm:$0xff] %v1806_v60  ;;  %v1818_v62 = vld [vmem:[%s2523_s1 + $0x8] sm:$0xff]  ;;  %v1825_v63 = vld [vmem:[%s2523_s1 + $0x100] sm:$0xff] }
  0x17   :  { %208 = vmatprep.subr.mxu1 %v1698_v42  ;;  %120 = vmatpush1.msra.mxu0 %v1705_v43  ;;  %2545 = vst [vmem:[#allocation7_spill] sm:$0xff] %v1818_v62  ;;  %v1830_v3 = vld [vmem:[%s2523_s1] sm:$0xff] }
  0x18   :  { %209 = vmatpush1.msra.mxu1 %v1710_v44  ;;  %121 = vmatprep.subr.mxu0 %v1717_v45  ;;  %2546 = vst [vmem:[#allocation8_spill] sm:$0xff] %v1830_v3 }
  0x19   :  { %210 = vmatprep.subr.mxu1 %v1722_v46  ;;  %122 = vmatpush1.msra.mxu0 %v1729_v47 }
  0x1a   :  { %211 = vmatpush1.msra.mxu1 %v1734_v48  ;;  %123 = vmatprep.subr.mxu0 %v1741_v49 }
  0x1b   :  { %212 = vmatprep.subr.mxu1 %v1746_v50  ;;  %124 = vmatpush1.msra.mxu0 %v1753_v51 }
  0x1c   :  { %213 = vmatpush1.msra.mxu1 %v1758_v52  ;;  %125 = vmatprep.subr.mxu0 %v1765_v53  ;;  %v1998_v52 = vld [vmem:[%s2523_s1 + $0x250] sm:$0xff] }
  0x1d   :  { %214 = vmatprep.subr.mxu1 %v1770_v54  ;;  %126 = vmatpush1.msra.mxu0 %v1777_v55  ;;  %v1845_v54 = vld [vmem:[%s2523_s1 + $0x2f8] sm:$0xff] }
  0x1e   :  { %215 = vmatpush1.msra.mxu1 %v1782_v56  ;;  %127 = vmatprep.subr.mxu0 %v1789_v57  ;;  %v62_v56 = vld [vmem:[%s2524_s0 + $0x1] sm:$0xff] }
  0x1f   :  { %216 = vmatprep.subr.mxu1 %v1794_v58  ;;  %128 = vmatpush1.msra.mxu0 %v1801_v59  ;;  %v26_v58 = vld [vmem:[%s2524_s0] sm:$0xff] }
  0x20   :  { %217 = vmatpush1.msra.mxu1 %v1806_v60  ;;  %129 = vmatprep.subr.mxu0 %v1813_v61  ;;  %v1852_v60 = vld [vmem:[%s2523_s1 + $0x2f0] sm:$0xff] }
  0x21   :  { %218 = vmatprep.subr.mxu1 %v1818_v62  ;;  %130 = vmatpush1.msra.mxu0 %v1825_v63  ;;  %v1857_v62 = vld [vmem:[%s2523_s1 + $0x2e8] sm:$0xff] }
  0x22   :  { %219 = vmatpush1.msra.mxu1 %v1830_v3  ;;  %164 = vmatmul.mubr.f32.vlgmr.msra.gmra.mxu0 %v62_v56  ;;  %v1864_v3 = vld [vmem:[%s2523_s1 + $0x2e0] sm:$0xff]  ;;  %v1871_v56 = vld [vmem:[%s2523_s1 + $0x2d8] sm:$0xff] }
  0x23   :  { %253 = vmatmul.mubr.f32.vlgmr.msra.gmra.mxu1 %v26_v58  ;;  %314 = vmatprep.subr.mxu0 %v1845_v54  ;;  %v2547_v58 = vmov 0.0  }
  0x24   :  { %487 = vmatprep.subr.mxu1 %v1455_v0  ;;  %315 = vmatpush1.msra.mxu0 %v1852_v60  ;;  %v1878_v0 = vld [vmem:[%s2523_s1 + $0x2d0] sm:$0xff] }
  0x25   :  { %488 = vmatpush1.msra.mxu1 %v1465_v2  ;;  %316 = vmatprep.subr.mxu0 %v1857_v62  ;;  %v1885_v2 = vld [vmem:[%s2523_s1 + $0x2c8] sm:$0xff] }
  0x26   :  { %489 = vmatprep.subr.mxu1 %v1479_v5  ;;  %317 = vmatpush1.msra.mxu0 %v1864_v3  ;;  %v1892_v5 = vld [vmem:[%s2523_s1 + $0x2c0] sm:$0xff] }
  0x27   :  { %490 = vmatpush1.msra.mxu1 %v1491_v7  ;;  %318 = vmatprep.subr.mxu0 %v1871_v56  ;;  %v1899_v7 = vld [vmem:[%s2523_s1 + $0x2b8] sm:$0xff] }
  0x28   :  { %491 = vmatprep.subr.mxu1 %v1501_v9  ;;  %319 = vmatpush1.msra.mxu0 %v1878_v0  ;;  %v1906_v9 = vld [vmem:[%s2523_s1 + $0x2b0] sm:$0xff] }
  0x29   :  { %492 = vmatpush1.msra.mxu1 %v1513_v11  ;;  %320 = vmatprep.subr.mxu0 %v1885_v2  ;;  %v1913_v11 = vld [vmem:[%s2523_s1 + $0x2a8] sm:$0xff] }
  0x2a   :  { %493 = vmatprep.subr.mxu1 %v1525_v13  ;;  %321 = vmatpush1.msra.mxu0 %v1892_v5  ;;  %v1920_v13 = vld [vmem:[%s2523_s1 + $0x2a0] sm:$0xff] }
  0x2b   :  { %494 = vmatpush1.msra.mxu1 %v1537_v15  ;;  %322 = vmatprep.subr.mxu0 %v1899_v7  ;;  %v1927_v15 = vld [vmem:[%s2523_s1 + $0x298] sm:$0xff] }
  0x2c   :  { %495 = vmatprep.subr.mxu1 %v1549_v17  ;;  %323 = vmatpush1.msra.mxu0 %v1906_v9  ;;  %v1934_v17 = vld [vmem:[%s2523_s1 + $0x290] sm:$0xff] }
  0x2d   :  { %496 = vmatpush1.msra.mxu1 %v1561_v19  ;;  %324 = vmatprep.subr.mxu0 %v1913_v11  ;;  %v1941_v19 = vld [vmem:[%s2523_s1 + $0x288] sm:$0xff] }
  0x2e   :  { %497 = vmatprep.subr.mxu1 %v1573_v21  ;;  %325 = vmatpush1.msra.mxu0 %v1920_v13  ;;  %v1948_v21 = vld [vmem:[%s2523_s1 + $0x280] sm:$0xff] }
  0x2f   :  { %498 = vmatpush1.msra.mxu1 %v1585_v23  ;;  %326 = vmatprep.subr.mxu0 %v1927_v15  ;;  %v1955_v23 = vld [vmem:[%s2523_s1 + $0x278] sm:$0xff] }
  0x30   :  { %499 = vmatprep.subr.mxu1 %v1597_v25  ;;  %327 = vmatpush1.msra.mxu0 %v1934_v17  ;;  %v1962_v25 = vld [vmem:[%s2523_s1 + $0x270] sm:$0xff] }
  0x31   :  { %500 = vmatpush1.msra.mxu1 %v1609_v27  ;;  %328 = vmatprep.subr.mxu0 %v1941_v19  ;;  %v1971_v27 = vld [vmem:[%s2523_s1 + $0x268] sm:$0xff] }
  0x32   :  { %501 = vmatprep.subr.mxu1 %v1621_v29  ;;  %329 = vmatpush1.msra.mxu0 %v1948_v21  ;;  %v63_v29 = vld [vmem:[%s2524_s0 + $0x9] sm:$0xff] }
  0x33   :  { %502 = vmatpush1.msra.mxu1 %v1633_v31  ;;  %330 = vmatprep.subr.mxu0 %v1955_v23  ;;  %v27_v31 = vld [vmem:[%s2524_s0 + $0x8] sm:$0xff] }
  0x34   :  { %503 = vmatprep.subr.mxu1 %v1645_v33  ;;  %331 = vmatpush1.msra.mxu0 %v1962_v25  ;;  %v1986_v33 = vld [vmem:[%s2523_s1 + $0x260] sm:$0xff] }
  0x35   :  { %504 = vmatpush1.msra.mxu1 %v1657_v35  ;;  %169 = vmatprep.mubr.f32.mxu0 %v2547_v58  ;;  %v1993_v35 = vld [vmem:[%s2523_s1 + $0x258] sm:$0xff] }
  0x36   :  { %258 = vmatprep.mubr.f32.mxu1 %v2547_v58  ;;  %332 = vmatprep.subr.mxu0 %v1971_v27 }
  0x37   :  { %505 = vmatprep.subr.mxu1 %v1669_v37  ;;  %170 = vmatmul.mubr.f32.gmra.mxu0 %v63_v29  ;;  %v2007_v37 = vld [vmem:[%s2523_s1 + $0x248] sm:$0xff]  ;;  %v64_v29 = vld [vmem:[%s2524_s0 + $0x11] sm:$0xff] }
  0x38   :  { %259 = vmatmul.mubr.f32.gmra.mxu1 %v27_v31  ;;  %333 = vmatpush1.msra.mxu0 %v1986_v33  ;;  %v2034_v31 = vld [vmem:[%s2523_s1 + $0x230] sm:$0xff] }
  0x39   :  { %506 = vmatpush1.msra.mxu1 %v1681_v39  ;;  %334 = vmatprep.subr.mxu0 %v1993_v35  ;;  %v28_v39 = vld [vmem:[%s2524_s0 + $0x10] sm:$0xff] }
  0x3a   :  { %507 = vmatprep.subr.mxu1 %v1693_v41  ;;  %335 = vmatpush1.msra.mxu0 %v1998_v52  ;;  %v2022_v41 = vld [vmem:[%s2523_s1 + $0x240] sm:$0xff] }
  0x3b   :  { %508 = vmatpush1.msra.mxu1 %v1705_v43  ;;  %175 = vmatprep.mubr.f32.mxu0 %v2547_v58  ;;  %v2029_v43 = vld [vmem:[%s2523_s1 + $0x238] sm:$0xff] }
  0x3c   :  { %264 = vmatprep.mubr.f32.mxu1 %v2547_v58  ;;  %336 = vmatprep.subr.mxu0 %v2007_v37 }
  0x3d   :  { %509 = vmatprep.subr.mxu1 %v1717_v45  ;;  %176 = vmatmul.mubr.f32.gmra.mxu0 %v64_v29  ;;  %v2043_v45 = vld [vmem:[%s2523_s1 + $0x228] sm:$0xff]  ;;  %v65_v29 = vld [vmem:[%s2524_s0 + $0x19] sm:$0xff] }
  0x3e   :  { %265 = vmatmul.mubr.f32.gmra.mxu1 %v28_v39  ;;  %337 = vmatpush1.msra.mxu0 %v2022_v41  ;;  %v2070_v39 = vld [vmem:[%s2523_s1 + $0x210] sm:$0xff] }
  0x3f   :  { %510 = vmatpush1.msra.mxu1 %v1729_v47  ;;  %338 = vmatprep.subr.mxu0 %v2029_v43  ;;  %v29_v47 = vld [vmem:[%s2524_s0 + $0x18] sm:$0xff] }
  0x40   :  { %511 = vmatprep.subr.mxu1 %v1741_v49  ;;  %339 = vmatpush1.msra.mxu0 %v2034_v31  ;;  %v2058_v49 = vld [vmem:[%s2523_s1 + $0x220] sm:$0xff] }
  0x41   :  { %512 = vmatpush1.msra.mxu1 %v1753_v51  ;;  %181 = vmatprep.mubr.f32.mxu0 %v2547_v58  ;;  %v2065_v51 = vld [vmem:[%s2523_s1 + $0x218] sm:$0xff] }
  0x42   :  { %270 = vmatprep.mubr.f32.mxu1 %v2547_v58  ;;  %340 = vmatprep.subr.mxu0 %v2043_v45 }
  0x43   :  { %513 = vmatprep.subr.mxu1 %v1765_v53  ;;  %182 = vmatmul.mubr.f32.gmra.mxu0 %v65_v29  ;;  %v2077_v53 = vld [vmem:[%s2523_s1 + $0x208] sm:$0xff]  ;;  %v2084_v29 = vld [vmem:[%s2523_s1 + $0x200] sm:$0xff] }
  0x44   :  { %271 = vmatmul.mubr.f32.gmra.mxu1 %v29_v47  ;;  %341 = vmatpush1.msra.mxu0 %v2058_v49 }
  0x45   :  { %514 = vmatpush1.msra.mxu1 %v1777_v55  ;;  %342 = vmatprep.subr.mxu0 %v2065_v51  ;;  %v277_v55 = vld [vmem:[%s2524_s0 + $0x2] sm:$0xff] }
  0x46   :  { %515 = vmatprep.subr.mxu1 %v1789_v57  ;;  %343 = vmatpush1.msra.mxu0 %v2070_v39  ;;  %v483_v57 = vld [vmem:[%s2524_s0 + $0x23] sm:$0xff] }
  0x47   :  { %516 = vmatpush1.msra.mxu1 %v1801_v59  ;;  %344 = vmatprep.subr.mxu0 %v2077_v53  ;;  %v278_v59 = vld [vmem:[%s2524_s0 + $0xa] sm:$0xff] }
  0x48   :  { %517 = vmatprep.subr.mxu1 %v1813_v61  ;;  %345 = vmatpush1.msra.mxu0 %v2084_v29  ;;  %v833_v61 = vld [vmem:[%s2525_s5 + $0x58] sm:$0xff] }
  0x49   :  { %378 = vmatprep.mubr.f32.mxu0 %v2547_v58  ;;  %518 = vmatpush1.msra.mxu1 %v1825_v63  ;;  %v832_v63 = vld [vmem:[%s2525_s5 + $0x50] sm:$0xff] }
  0x4a   :  { %379 = vmatmul.mubr.f32.vlgmr.msra.gmra.mxu0 %v277_v55  ;;  %551 = vmatprep.mubr.f32.mxu1 %v2547_v58 }
  0x4b   :  { %576 = vmatprep.subr.mxu0 %v1460_v1  ;;  %669 = vmatprep.subr.mxu1 %v1845_v54  ;;  %v279_v1 = vld [vmem:[%s2524_s0 + $0x12] sm:$0xff]  ;;  %v834_v54 = vld [vmem:[%s2525_s5 + $0x60] sm:$0xff] }
  0x4c   :  { %552 = vmatmul.mubr.f32.vlgmr.msra.gmra.mxu1 %v483_v57  ;;  %577 = vmatpush1.msra.mxu0 %v1474_v4  ;;  %v484_v4 = vld [vmem:[%s2524_s0 + $0x2b] sm:$0xff] }
  0x4d   :  { %670 = vmatpush1.msra.mxu1 %v1852_v60  ;;  %578 = vmatprep.subr.mxu0 %v1484_v6  ;;  %v485_v6 = vld [vmem:[%s2524_s0 + $0x33] sm:$0xff] }
  0x4e   :  { %671 = vmatprep.subr.mxu1 %v1857_v62  ;;  %384 = vmatprep.mubr.f32.mxu0 %v2547_v58  ;;  %v849_v60 = vld [vmem:[%s2525_s5 + $0xd8] sm:$0xff]  ;;  %v848_v62 = vld [vmem:[%s2525_s5 + $0xd0] sm:$0xff] }
  0x4f   :  { %579 = vmatpush1.msra.mxu0 %v1496_v8  ;;  %672 = vmatpush1.msra.mxu1 %v1864_v3  ;;  %v280_v3 = vld [vmem:[%s2524_s0 + $0x1a] sm:$0xff] }
  0x50   :  { %385 = vmatmul.mubr.f32.gmra.mxu0 %v278_v59  ;;  %580 = vmatprep.subr.mxu0 %v1508_v10  ;;  %v2548_v8 = vld [vmem:[#allocation2_spill] sm:$0xff]  ;;  %v2549_v10 = vld [vmem:[#allocation3_spill] sm:$0xff] }
  0x51   :  { %673 = vmatprep.subr.mxu1 %v1871_v56  ;;  %581 = vmatpush1.msra.mxu0 %v1518_v12  ;;  %v486_v12 = vld [vmem:[%s2524_s0 + $0x3b] sm:$0xff]  ;;  %v847_v56 = vld [vmem:[%s2525_s5 + $0xc8] sm:$0xff] }
  0x52   :  { %674 = vmatpush1.msra.mxu1 %v1878_v0  ;;  %582 = vmatprep.subr.mxu0 %v1530_v14  ;;  %v2550_v14 = vld [vmem:[#allocation4_spill] sm:$0xff]  ;;  %v831_v0 = vld [vmem:[%s2525_s5 + $0x48] sm:$0xff] }
  0x53   :  { %675 = vmatprep.subr.mxu1 %v1885_v2  ;;  %390 = vmatprep.mubr.f32.mxu0 %v2547_v58  ;;  %v846_v2 = vld [vmem:[%s2525_s5 + $0xc0] sm:$0xff] }
  0x54   :  { %583 = vmatpush1.msra.mxu0 %v1542_v16  ;;  %676 = vmatpush1.msra.mxu1 %v1892_v5  ;;  %v2551_v16 = vld [vmem:[#allocation5_spill] sm:$0xff]  ;;  %v830_v5 = vld [vmem:[%s2525_s5 + $0x40] sm:$0xff] }
  0x55   :  { %391 = vmatmul.mubr.f32.gmra.mxu0 %v279_v1  ;;  %584 = vmatprep.subr.mxu0 %v1554_v18  ;;  %v2552_v18 = vld [vmem:[#allocation6_spill] sm:$0xff] }
  0x56   :  { %677 = vmatprep.subr.mxu1 %v1899_v7  ;;  %585 = vmatpush1.msra.mxu0 %v1566_v20  ;;  %v2553_v20 = vld [vmem:[#allocation7_spill] sm:$0xff]  ;;  %v845_v7 = vld [vmem:[%s2525_s5 + $0xb8] sm:$0xff] }
  0x57   :  { %678 = vmatpush1.msra.mxu1 %v1906_v9  ;;  %586 = vmatprep.subr.mxu0 %v1578_v22  ;;  %v479_v22 = vld [vmem:[%s2524_s0 + $0x22] sm:$0xff]  ;;  %v829_v9 = vld [vmem:[%s2525_s5 + $0x38] sm:$0xff] }
  0x58   :  { %679 = vmatprep.subr.mxu1 %v1913_v11  ;;  %396 = vmatprep.mubr.f32.mxu0 %v2547_v58  ;;  %v844_v11 = vld [vmem:[%s2525_s5 + $0xb0] sm:$0xff] }
  0x59   :  { %587 = vmatpush1.msra.mxu0 %v1590_v24  ;;  %680 = vmatpush1.msra.mxu1 %v1920_v13  ;;  %v665_v24 = vld [vmem:[%s2524_s0 + $0x24] sm:$0xff]  ;;  %v828_v13 = vld [vmem:[%s2525_s5 + $0x30] sm:$0xff] }
  0x5a   :  { %397 = vmatmul.mubr.f32.gmra.mxu0 %v280_v3  ;;  %588 = vmatprep.subr.mxu0 %v1602_v26  ;;  %v2554_v26 = vld [vmem:[#allocation8_spill] sm:$0xff] }
  0x5b   :  { %681 = vmatprep.subr.mxu1 %v1927_v15  ;;  %589 = vmatpush1.msra.mxu0 %v1614_v28  ;;  %v480_v28 = vld [vmem:[%s2524_s0 + $0x2a] sm:$0xff] }
  0x5c   :  { %682 = vmatpush1.msra.mxu1 %v1934_v17  ;;  %590 = vmatprep.subr.mxu0 %v1626_v30  ;;  %v666_v30 = vld [vmem:[%s2524_s0 + $0x2c] sm:$0xff] }
  0x5d   :  { %683 = vmatprep.subr.mxu1 %v1941_v19  ;;  %591 = vmatpush1.msra.mxu0 %v1638_v32  ;;  %v481_v32 = vld [vmem:[%s2524_s0 + $0x32] sm:$0xff]  ;;  %v843_v15 = vld [vmem:[%s2525_s5 + $0xa8] sm:$0xff]  ;;  %v842_v19 = vld [vmem:[%s2525_s5 + $0xa0] sm:$0xff] }
  0x5e   :  { %684 = vmatpush1.msra.mxu1 %v1948_v21  ;;  %592 = vmatprep.subr.mxu0 %v1650_v34  ;;  %v667_v34 = vld [vmem:[%s2524_s0 + $0x34] sm:$0xff]  ;;  %v827_v17 = vld [vmem:[%s2525_s5 + $0x28] sm:$0xff]  ;;  %v826_v21 = vld [vmem:[%s2525_s5 + $0x20] sm:$0xff] }
  0x5f   :  { %685 = vmatprep.subr.mxu1 %v1955_v23  ;;  %593 = vmatpush1.msra.mxu0 %v1662_v36  ;;  %v482_v36 = vld [vmem:[%s2524_s0 + $0x3a] sm:$0xff] }
  0x60   :  { %686 = vmatpush1.msra.mxu1 %v1962_v25  ;;  %594 = vmatprep.subr.mxu0 %v1674_v38  ;;  %v668_v38 = vld [vmem:[%s2524_s0 + $0x3c] sm:$0xff] }
  0x61   :  { %687 = vmatprep.subr.mxu1 %v1971_v27  ;;  %557 = vmatprep.mubr.f32.mxu1 %v2547_v58  ;;  %v841_v23 = vld [vmem:[%s2525_s5 + $0x98] sm:$0xff]  ;;  %v840_v27 = vld [vmem:[%s2525_s5 + $0x90] sm:$0xff] }
  0x62   :  { %595 = vmatpush1.msra.mxu0 %v1686_v40  ;;  %688 = vmatpush1.msra.mxu1 %v1986_v33  ;;  %v853_v40 = vld [vmem:[%s2525_s5 + $0xf8] sm:$0xff]  ;;  %v824_v33 = vld [vmem:[%s2525_s5 + $0x10] sm:$0xff] }
  0x63   :  { %596 = vmatprep.subr.mxu0 %v1698_v42  ;;  %558 = vmatmul.mubr.f32.gmra.mxu1 %v484_v4  ;;  %v837_v42 = vld [vmem:[%s2525_s5 + $0x78] sm:$0xff] }
  0x64   :  { %689 = vmatprep.subr.mxu1 %v1993_v35  ;;  %597 = vmatpush1.msra.mxu0 %v1710_v44  ;;  %v852_v44 = vld [vmem:[%s2525_s5 + $0xf0] sm:$0xff]  ;;  %v825_v25 = vld [vmem:[%s2525_s5 + $0x18] sm:$0xff]  ;;  %v839_v35 = vld [vmem:[%s2525_s5 + $0x88] sm:$0xff] }
  0x65   :  { %690 = vmatpush1.msra.mxu1 %v1998_v52  ;;  %598 = vmatprep.subr.mxu0 %v1722_v46  ;;  %v836_v46 = vld [vmem:[%s2525_s5 + $0x70] sm:$0xff]  ;;  %v850_v52 = vld [vmem:[%s2525_s5 + $0xe0] sm:$0xff] }
  0x66   :  { %691 = vmatprep.subr.mxu1 %v2007_v37  ;;  %563 = vmatprep.mubr.f32.mxu1 %v2547_v58  ;;  %v823_v37 = vld [vmem:[%s2525_s5 + $0x8] sm:$0xff] }
  0x67   :  { %599 = vmatpush1.msra.mxu0 %v1734_v48  ;;  %692 = vmatpush1.msra.mxu1 %v2022_v41  ;;  %v851_v48 = vld [vmem:[%s2525_s5 + $0xe8] sm:$0xff]  ;;  %v838_v41 = vld [vmem:[%s2525_s5 + $0x80] sm:$0xff] }
  0x68   :  { %600 = vmatprep.subr.mxu0 %v1746_v50  ;;  %564 = vmatmul.mubr.f32.gmra.mxu1 %v485_v6  ;;  %v835_v50 = vld [vmem:[%s2525_s5 + $0x68] sm:$0xff] }
  0x69   :  { %693 = vmatprep.subr.mxu1 %v2029_v43  ;;  %601 = vmatpush1.msra.mxu0 %v2548_v8  ;;  %v822_v43 = vld [vmem:[%s2525_s5] sm:$0xff] }
  0x6a   :  { %694 = vmatpush1.msra.mxu1 %v2034_v31  ;;  %602 = vmatprep.subr.mxu0 %v2549_v10 }
  0x6b   :  { %695 = vmatprep.subr.mxu1 %v2043_v45  ;;  %569 = vmatprep.mubr.f32.mxu1 %v2547_v58 }
  0x6c   :  { %603 = vmatpush1.msra.mxu0 %v2550_v14  ;;  %696 = vmatpush1.msra.mxu1 %v2058_v49 }
  0x6d   :  { %604 = vmatprep.subr.mxu0 %v2551_v16  ;;  %570 = vmatmul.mubr.f32.gmra.mxu1 %v486_v12 }
  0x6e   :  { %697 = vmatprep.subr.mxu1 %v2065_v51  ;;  %605 = vmatpush1.msra.mxu0 %v2552_v18 }
  0x6f   :  { %698 = vmatpush1.msra.mxu1 %v2070_v39  ;;  %606 = vmatprep.subr.mxu0 %v2553_v20  ;;  %v413_v20 = vlaneseq }
  0x70   :  { %699 = vmatprep.subr.mxu1 %v2077_v53  ;;  %607 = vmatpush1.msra.mxu0 %v2554_v26 }
  0x71   :  { %640 = vmatprep.mubr.f32.mxu0 %v2547_v58  ;;  %700 = vmatpush1.msra.mxu1 %v2084_v29  ;;  %v414_v26 = vshrl.u32 %v413_v20, 7 }
  0x72   :  { %733 = vmatprep.mubr.f32.mxu1 %v2547_v58  ;;  %641 = vmatmul.mubr.f32.vlgmr.msra.gmra.mxu0 %v479_v22 }
  0x73   :  { %734 = vmatmul.mubr.f32.vlgmr.msra.gmra.mxu1 %v665_v24  ;;  %646 = vmatprep.mubr.f32.mxu0 %v2547_v58 }
  0x74   :  { %739 = vmatprep.mubr.f32.mxu1 %v2547_v58  ;;  %1338 = vmatprep.subr.mxu0 %v853_v40 }
  0x75   :  { %1373 = vmatprep.subr.mxu1 %v853_v40  ;;  %1339 = vmatpush3.msra.mxu0 %v837_v42 }
  0x76   :  { %647 = vmatmul.mubr.f32.gmra.mxu0 %v480_v28  ;;  %1374 = vmatpush3.msra.mxu1 %v837_v42  ;;  %v419_v42 = vsub.s32 1, %v414_v26 }
  0x77   :  { %740 = vmatmul.mubr.f32.gmra.mxu1 %v666_v30  ;;  %652 = vmatprep.mubr.f32.mxu0 %v2547_v58 }
  0x78   :  { %745 = vmatprep.mubr.f32.mxu1 %v2547_v58  ;;  %1340 = vmatprep.subr.mxu0 %v852_v44 }
  0x79   :  { %1375 = vmatprep.subr.mxu1 %v852_v44  ;;  %1341 = vmatpush3.msra.mxu0 %v836_v46 }
  0x7a   :  { %653 = vmatmul.mubr.f32.gmra.mxu0 %v481_v32  ;;  %1376 = vmatpush3.msra.mxu1 %v836_v46 }
  0x7b   :  { %746 = vmatmul.mubr.f32.gmra.mxu1 %v667_v34  ;;  %658 = vmatprep.mubr.f32.mxu0 %v2547_v58  ;;  %v2318_v34 = vsub.s32 0, %v414_v26 }
  0x7c   :  { %751 = vmatprep.mubr.f32.mxu1 %v2547_v58  ;;  %1342 = vmatprep.subr.mxu0 %v851_v48 }
  0x7d   :  { %1377 = vmatprep.subr.mxu1 %v851_v48  ;;  %1343 = vmatpush3.msra.mxu0 %v835_v50 }
  0x7e   :  { %659 = vmatmul.mubr.f32.gmra.mxu0 %v482_v36  ;;  %1378 = vmatpush3.msra.mxu1 %v835_v50 }
  0x7f   :  { %752 = vmatmul.mubr.f32.gmra.mxu1 %v668_v38  ;;  %1344 = vmatprep.subr.mxu0 %v850_v52  ;;  %v411_v38 = vld [vmem:[%s2526_s2] sm:$0x3] }
  0x80   :  { %1379 = vmatprep.subr.mxu1 %v850_v52  ;;  %1345 = vmatpush3.msra.mxu0 %v834_v54 }
  0x81   :  { %1380 = vmatpush3.msra.mxu1 %v834_v54  ;;  %1346 = vmatprep.subr.mxu0 %v849_v60 }
  0x82   :  { %1381 = vmatprep.subr.mxu1 %v849_v60  ;;  %1347 = vmatpush3.msra.mxu0 %v833_v61 }
  0x83   :  { %1382 = vmatpush3.msra.mxu1 %v833_v61  ;;  %1348 = vmatprep.subr.mxu0 %v848_v62 }
  0x84   :  { %1383 = vmatprep.subr.mxu1 %v848_v62  ;;  %1349 = vmatpush3.msra.mxu0 %v832_v63  ;;  %v2328_v62 = vrot.slane %v411_v38, %v2318_v34 }
  0x85   :  { %1384 = vmatpush3.msra.mxu1 %v832_v63  ;;  %1350 = vmatprep.subr.mxu0 %v847_v56 }
  0x86   :  { %1385 = vmatprep.subr.mxu1 %v847_v56  ;;  %1351 = vmatpush3.msra.mxu0 %v831_v0 }
  0x87   :  { %1386 = vmatpush3.msra.mxu1 %v831_v0  ;;  %1352 = vmatprep.subr.mxu0 %v846_v2 }
  0x88   :  { %1387 = vmatprep.subr.mxu1 %v846_v2  ;;  %1353 = vmatpush3.msra.mxu0 %v830_v5 }
  0x89   :  { %1388 = vmatpush3.msra.mxu1 %v830_v5  ;;  %1354 = vmatprep.subr.mxu0 %v845_v7 }
  0x8a   :  { %1389 = vmatprep.subr.mxu1 %v845_v7  ;;  %1355 = vmatpush3.msra.mxu0 %v829_v9  ;;  %v2330_v7 = vrot.slane %v411_v38, %v419_v42 }
  0x8b   :  { %1390 = vmatpush3.msra.mxu1 %v829_v9  ;;  %1356 = vmatprep.subr.mxu0 %v844_v11 }
  0x8c   :  { %1391 = vmatprep.subr.mxu1 %v844_v11  ;;  %1357 = vmatpush3.msra.mxu0 %v828_v13 }
  0x8d   :  { %1392 = vmatpush3.msra.mxu1 %v828_v13  ;;  %1358 = vmatprep.subr.mxu0 %v843_v15 }
  0x8e   :  { %1393 = vmatprep.subr.mxu1 %v843_v15  ;;  %1359 = vmatpush3.msra.mxu0 %v827_v17 }
  0x8f   :  { %1394 = vmatpush3.msra.mxu1 %v827_v17  ;;  %1360 = vmatprep.subr.mxu0 %v842_v19 }
  0x90   :  { %1395 = vmatprep.subr.mxu1 %v842_v19  ;;  %1361 = vmatpush3.msra.mxu0 %v826_v21 }
  0x91   :  { %1396 = vmatpush3.msra.mxu1 %v826_v21  ;;  %1362 = vmatprep.subr.mxu0 %v841_v23 }
  0x92   :  { %1397 = vmatprep.subr.mxu1 %v841_v23  ;;  %1363 = vmatpush3.msra.mxu0 %v825_v25 }
  0x93   :  { %1398 = vmatpush3.msra.mxu1 %v825_v25  ;;  %1364 = vmatprep.subr.mxu0 %v840_v27 }
  0x94   :  { %1399 = vmatprep.subr.mxu1 %v840_v27  ;;  %1365 = vmatpush3.msra.mxu0 %v824_v33 }
  0x95   :  { %1400 = vmatpush3.msra.mxu1 %v824_v33  ;;  %1366 = vmatprep.subr.mxu0 %v839_v35 }
  0x96   :  { %1401 = vmatprep.subr.mxu1 %v839_v35  ;;  %1367 = vmatpush3.msra.mxu0 %v823_v37 }
  0x97   :  { %1402 = vmatpush3.msra.mxu1 %v823_v37  ;;  %1368 = vmatprep.subr.mxu0 %v838_v41 }
  0x98   :  { %1403 = vmatprep.subr.mxu1 %v838_v41  ;;  %1369 = vmatpush3.msra.mxu0 %v822_v43 }
  0x99   :  { %1404 = vmatpush3.msra.mxu1 %v822_v43 }
  0xe2   :  { %v165_v31 = vpop.f32.mrf.mxu0 }
  0xe3   :  { %v254_v51 = vpop.f32.mrf.mxu1 }
  0xe4   :  { %v167_v45 = vpop.f32.mrf.mxu0  ;;  %v255_v44 = vadd.f32 %v254_v51, %v165_v31 }
  0xe5   :  { %v256_v53 = vpop.f32.mrf.mxu1 }
  0xe6   :  { %v257_v60 = vadd.f32 %v256_v53, %v167_v45 }
  0xf7   :  { %v171_v47 = vpop.f32.mrf.mxu0 }
  0xf8   :  { %v260_v55 = vpop.f32.mrf.mxu1 }
  0xf9   :  { %v173_v49 = vpop.f32.mrf.mxu0  ;;  %v261_v36 = vadd.f32 %v260_v55, %v171_v47 }
  0xfa   :  { %v262_v59 = vpop.f32.mrf.mxu1 }
  0xfb   :  { %v263_v46 = vadd.f32 %v262_v59, %v173_v49 }
  0xfd   :  { %v177_v39 = vpop.f32.mrf.mxu0 }
  0xfe   :  { %v266_v3 = vpop.f32.mrf.mxu1 }
  0xff   :  { %v179_v29 = vpop.f32.mrf.mxu0  ;;  %v267_v48 = vadd.f32 %v266_v3, %v177_v39 }
 0x100   :  { %v268_v6 = vpop.f32.mrf.mxu1 }
 0x101   :  { %v269_v61 = vadd.f32 %v268_v6, %v179_v29 }
 0x103   :  { %v183_v57 = vpop.f32.mrf.mxu0 }
 0x104   :  { %v272_v10 = vpop.f32.mrf.mxu1 }
 0x105   :  { %v185_v1 = vpop.f32.mrf.mxu0  ;;  %v273_v63 = vadd.f32 %v272_v10, %v183_v57 }
 0x106   :  { %v274_v14 = vpop.f32.mrf.mxu1 }
 0x107   :  { %v275_v19 = vadd.f32 %v274_v14, %v185_v1 }
 0x10a   :  { %v380_v4 = vpop.f32.mrf.mxu0 }
 0x10b   :  { %v403_v56 = vadd.f32 %v380_v4, %v255_v44 }
 0x10c   :  { %v382_v8 = vpop.f32.mrf.mxu0  ;;  %v553_v16 = vpop.f32.mrf.mxu1 }
 0x10d   :  { %v404_v5 = vadd.f32 %v382_v8, %v257_v60  ;;  %v2340_v23 = vadd.f32 %v2328_v62, %v403_v56 }
 0x10e   :  { %v555_v22 = vpop.f32.mrf.mxu1 }
 0x10f   :  { %v2349_v33 = vadd.f32 %v2330_v7, %v404_v5  ;;  %v451_v29 = vmul.f32 %v2340_v23, %v2340_v23 }
 0x110   :  { %v386_v12 = vpop.f32.mrf.mxu0 }
 0x111   :  { %v405_v50 = vadd.f32 %v386_v12, %v261_v36  ;;  %v452_v55 = vmul.f32 %v2349_v33, %v2349_v33 }
 0x112   :  { %v388_v18 = vpop.f32.mrf.mxu0 }
 0x113   :  { %v406_v0 = vadd.f32 %v388_v18, %v263_v46  ;;  %v2335_v11 = vadd.f32 %v2328_v62, %v405_v50 }
 0x115   :  { %v392_v24 = vpop.f32.mrf.mxu0  ;;  %v2343_v25 = vadd.f32 %v2330_v7, %v406_v0  ;;  %v431_v37 = vadd.f32 %v2335_v11, %v2340_v23  ;;  %v453_v47 = vmul.f32 %v2335_v11, %v2335_v11 }
 0x116   :  { %v407_v2 = vadd.f32 %v392_v24, %v267_v48 }
 0x117   :  { %v394_v32 = vpop.f32.mrf.mxu0  ;;  %v454_v49 = vmul.f32 %v2343_v25, %v2343_v25  ;;  %v440_v1 = vadd.f32 %v2343_v25, %v2349_v33  ;;  %v459_v18 = vadd.f32 %v453_v47, %v451_v29 }
 0x118   :  { %v408_v13 = vadd.f32 %v394_v32, %v269_v61  ;;  %v2346_v27 = vadd.f32 %v2328_v62, %v407_v2 }
 0x119   :  { %v468_v20 = vadd.f32 %v454_v49, %v452_v55 }
 0x11a   :  { %v398_v52 = vpop.f32.mrf.mxu0  ;;  %v2354_v41 = vadd.f32 %v2330_v7, %v408_v13  ;;  %v432_v51 = vadd.f32 %v431_v37, %v2346_v27  ;;  %v455_v3 = vmul.f32 %v2346_v27, %v2346_v27 }
 0x11b   :  { %v409_v15 = vadd.f32 %v398_v52, %v273_v63 }
 0x11c   :  { %v400_v17 = vpop.f32.mrf.mxu0  ;;  %v456_v4 = vmul.f32 %v2354_v41, %v2354_v41  ;;  %v441_v24 = vadd.f32 %v440_v1, %v2354_v41  ;;  %v460_v46 = vadd.f32 %v459_v18, %v455_v3 }
 0x11d   :  { %v410_v35 = vadd.f32 %v400_v17, %v275_v19  ;;  %v2357_v43 = vadd.f32 %v2328_v62, %v409_v15 }
 0x11e   :  { %v469_v48 = vadd.f32 %v468_v20, %v456_v4 }
 0x11f   :  { %v2369_v57 = vadd.f32 %v2330_v7, %v410_v35  ;;  %v433_v6 = vadd.f32 %v432_v51, %v2357_v43 }
 0x121   :  { %v458_v36 = vmul.f32 %v2369_v57, %v2369_v57  ;;  %v442_v52 = vadd.f32 %v441_v24, %v2369_v57 }
 0x123   :  { %v559_v28 = vpop.f32.mrf.mxu1  ;;  %v470_v13 = vadd.f32 %v469_v48, %v458_v36 }
 0x125   :  { %v2316_v30 = vpop.f32.mrf.mxu1  ;;  %v471_v55 = vrot.slane %v470_v13, 4 }
 0x128   :  { %v2323_v40 = vpop.f32.mrf.mxu1 }
 0x12a   :  { %v2325_v54 = vpop.f32.mrf.mxu1 }
 0x12d   :  { %v2332_v9 = vpop.f32.mrf.mxu1 }
 0x12f   :  { %v2337_v21 = vpop.f32.mrf.mxu1 }
 0x132   :  { %v642_v31 = vpop.f32.mrf.mxu0 }
 0x133   :  { %v735_v45 = vpop.f32.mrf.mxu1  ;;  %v643_v59 = vadd.f32 %v642_v31, %v553_v16  ;;  %v457_v16 = vmul.f32 %v2357_v43, %v2357_v43 }
 0x134   :  { %v644_v39 = vpop.f32.mrf.mxu0 }
 0x135   :  { %v737_v53 = vpop.f32.mrf.mxu1  ;;  %v645_v12 = vadd.f32 %v644_v39, %v555_v22  ;;  %v758_v38 = vadd.f32 %v735_v45, %v643_v59  ;;  %v434_v22 = vrot.slane %v433_v6, 4  ;;  %v461_v56 = vadd.f32 %v460_v46, %v457_v16 }
 0x136   :  { %v648_v8 = vpop.f32.mrf.mxu0 }
 0x137   :  { %v741_v10 = vpop.f32.mrf.mxu1  ;;  %v649_v14 = vadd.f32 %v648_v8, %v559_v28  ;;  %v759_v60 = vadd.f32 %v737_v53, %v645_v12  ;;  %v435_v31 = vadd.f32 %v434_v22, %v433_v6  ;;  %v462_v49 = vrot.slane %v461_v56, 4 }
 0x138   :  { %v650_v26 = vpop.f32.mrf.mxu0 }
 0x139   :  { %v743_v32 = vpop.f32.mrf.mxu1  ;;  %v760_v42 = vadd.f32 %v741_v10, %v649_v14  ;;  %v651_v44 = vadd.f32 %v650_v26, %v2316_v30  ;;  %v2390_v30 = vadd.f32 %v758_v38, %v2328_v62  ;;  %v2397_v45 = vadd.f32 %v759_v60, %v2330_v7 }
 0x13a   :  { %v654_v28 = vpop.f32.mrf.mxu0  ;;  %v472_v38 = vadd.f32 %v471_v55, %v470_v13 }
 0x13b   :  { %v747_v50 = vpop.f32.mrf.mxu1  ;;  %v761_v61 = vadd.f32 %v743_v32, %v651_v44  ;;  %v655_v63 = vadd.f32 %v654_v28, %v2323_v40  ;;  %v2387_v0 = vadd.f32 %v760_v42, %v2328_v62  ;;  %v443_v40 = vrot.slane %v442_v52, 4 }
 0x13c   :  { %v656_v2 = vpop.f32.mrf.mxu0  ;;  %v795_v12 = vmul.f32 %v2397_v45, %v2397_v45  ;;  %v463_v42 = vadd.f32 %v462_v49, %v461_v56 }
 0x13d   :  { %v749_v5 = vpop.f32.mrf.mxu1  ;;  %v2393_v15 = vadd.f32 %v761_v61, %v2330_v7  ;;  %v762_v17 = vadd.f32 %v747_v50, %v655_v63  ;;  %v657_v19 = vadd.f32 %v656_v2, %v2325_v54  ;;  %v796_v51 = vmul.f32 %v2387_v0, %v2387_v0 }
 0x13e   :  { %v660_v35 = vpop.f32.mrf.mxu0  ;;  %v794_v54 = vmul.f32 %v2390_v30, %v2390_v30  ;;  %v774_v3 = vadd.f32 %v2387_v0, %v2390_v30  ;;  %v444_v10 = vadd.f32 %v443_v40, %v442_v52  ;;  %v436_v52 = vrot.slane %v435_v31, 2 }
 0x13f   :  { %v753_v37 = vpop.f32.mrf.mxu1  ;;  %v2400_v47 = vadd.f32 %v762_v17, %v2328_v62  ;;  %v763_v39 = vadd.f32 %v749_v5, %v657_v19  ;;  %v661_v53 = vadd.f32 %v660_v35, %v2332_v9  ;;  %v797_v59 = vmul.f32 %v2393_v15, %v2393_v15 }
 0x140   :  { %v662_v29 = vpop.f32.mrf.mxu0  ;;  %v783_v14 = vadd.f32 %v2393_v15, %v2397_v45  ;;  %v445_v50 = vrot.slane %v444_v10, 2  ;;  %v473_v2 = vrot.slane %v472_v38, 2  ;;  %v464_v56 = vrot.slane %v463_v42, 2 }
 0x141   :  { %v663_v1 = vadd.f32 %v662_v29, %v2337_v21  ;;  %v798_v4 = vmul.f32 %v2400_v47, %v2400_v47  ;;  %v2415_v6 = vadd.f32 %v763_v39, %v2330_v7  ;;  %v764_v9 = vadd.f32 %v753_v37, %v661_v53  ;;  %v755_v8 = vpop.f32.mrf.mxu1 }
 0x142   :  { %v802_v21 = vadd.f32 %v796_v51, %v794_v54  ;;  %v775_v20 = vadd.f32 %v774_v3, %v2400_v47  ;;  %v811_v26 = vadd.f32 %v797_v59, %v795_v12  ;;  %v446_v35 = vadd.f32 %v445_v50, %v444_v10  ;;  %v1006_v50 = vld [vmem:[%s2527_s6 + $0x8] sm:$0xff] }
 0x143   :  { %v765_v18 = vadd.f32 %v755_v8, %v663_v1  ;;  %v799_v24 = vmul.f32 %v2415_v6, %v2415_v6  ;;  %v2425_v16 = vadd.f32 %v764_v9, %v2328_v62  ;;  %v784_v32 = vadd.f32 %v783_v14, %v2415_v6  ;;  %1041 = vmatprep.subr.mxu0 %v1006_v50 }
 0x144   :  { %v803_v44 = vadd.f32 %v802_v21, %v798_v4  ;;  %v437_v37 = vadd.f32 %v436_v52, %v435_v31  ;;  %v474_v39 = vadd.f32 %v473_v2, %v472_v38  ;;  %v465_v29 = vadd.f32 %v464_v56, %v463_v42  ;;  %v1005_v52 = vld [vmem:[%s2527_s6] sm:$0xff]  ;;  %1115 = vmatprep.subr.mxu1 %v1006_v50 }
 0x145   :  { %v2429_v36 = vadd.f32 %v765_v18, %v2330_v7  ;;  %v776_v46 = vadd.f32 %v775_v20, %v2425_v16  ;;  %v800_v48 = vmul.f32 %v2425_v16, %v2425_v16  ;;  %v812_v22 = vadd.f32 %v811_v26, %v799_v24 }
 0x146   :  { %v447_v59 = vrot.slane %v446_v35, 1  ;;  %v438_v4 = vrot.slane %v437_v37, 1  ;;  %v475_v14 = vrot.slane %v474_v39, 1  ;;  %v466_v21 = vrot.slane %v465_v29, 1 }
 0x147   :  { %v785_v28 = vadd.f32 %v784_v32, %v2429_v36  ;;  %v801_v62 = vmul.f32 %v2429_v36, %v2429_v36  ;;  %v777_v60 = vrot.slane %v776_v46, 4  ;;  %v804_v61 = vadd.f32 %v803_v44, %v800_v48 }
 0x148   :  { %v448_v20 = vadd.f32 %v447_v59, %v446_v35  ;;  %v439_v32 = vadd.f32 %v438_v4, %v437_v37  ;;  %v476_v44 = vadd.f32 %v475_v14, %v474_v39  ;;  %v998_v35 = vld [vmem:[%s2528_s3] sm:$0x1] }
 0x149   :  { %v786_v7 = vrot.slane %v785_v28, 4  ;;  %v813_v63 = vadd.f32 %v812_v22, %v801_v62  ;;  %v778_v5 = vadd.f32 %v777_v60, %v776_v46  ;;  %v805_v13 = vrot.slane %v804_v61, 4 }
 0x14a   :  { %v467_v22 = vadd.f32 %v466_v21, %v465_v29 }
 0x14b   :  { %v787_v17 = vadd.f32 %v786_v7, %v785_v28  ;;  %v814_v19 = vrot.slane %v813_v63, 4  ;;  %v779_v40 = vrot.slane %v778_v5, 2  ;;  %v806_v49 = vadd.f32 %v805_v13, %v804_v61 }
 0x14d   :  { %v788_v51 = vrot.slane %v787_v17, 2  ;;  %v815_v53 = vadd.f32 %v814_v19, %v813_v63  ;;  %v780_v55 = vadd.f32 %v779_v40, %v778_v5  ;;  %v807_v54 = vrot.slane %v806_v49, 2 }
 0x14f   :  { %v789_v1 = vadd.f32 %v788_v51, %v787_v17  ;;  %v816_v3 = vrot.slane %v815_v53, 2  ;;  %v781_v9 = vrot.slane %v780_v55, 1  ;;  %v808_v8 = vadd.f32 %v807_v54, %v806_v49  ;;  %v1002_v49 = vld [vmem:[%s2529_s4] sm:$0x1] }
 0x151   :  { %v790_v12 = vrot.slane %v789_v1, 1  ;;  %v817_v18 = vadd.f32 %v816_v3, %v815_v53  ;;  %v782_v10 = vadd.f32 %v781_v9, %v780_v55  ;;  %v809_v31 = vrot.slane %v808_v8, 1 }
 0x153   :  { %v791_v24 = vadd.f32 %v790_v12, %v789_v1  ;;  %v818_v26 = vrot.slane %v817_v18, 1  ;;  %v810_v38 = vadd.f32 %v809_v31, %v808_v8  ;;  %v792_v48 = vadd.f32 %v782_v10, %v439_v32 }
 0x155   :  { %v793_v42 = vadd.f32 %v791_v24, %v448_v20  ;;  %v819_v46 = vadd.f32 %v818_v26, %v817_v18  ;;  %v820_v62 = vadd.f32 %v810_v38, %v467_v22 }
 0x157   :  { %918 = vmatprep.mubr.f32.mxu0 %v793_v42  ;;  %v821_v28 = vadd.f32 %v819_v46, %v476_v44 }
 0x158   :  { %919 = vmatmul.mubr.f32.vlgmr.msra.gmra.mxu0 %v792_v48 }
 0x159   :  { %988 = vmatprep.mubr.f32.mxu1 %v821_v28  ;;  %1075 = vmatprep.mubr.f32.mxu0 %v2547_v58 }
 0x15a   :  { %989 = vmatmul.mubr.f32.vlgmr.msra.gmra.mxu1 %v820_v62  ;;  %1042 = vmatpush1.msra.mxu0 %v1005_v52 }
 0x15b   :  { %1149 = vmatprep.mubr.f32.mxu1 %v2547_v58  ;;  %1116 = vmatpush1.msra.mxu1 %v1005_v52 }
 0x218   :  { %v1370_v60 = vpop.f32.mrf.mxu0 }
 0x21a   :  { %v1371_v61 = vpop.f32.mrf.mxu0  ;;  %v1405_v7 = vpop.f32.mrf.mxu1 }
 0x21b   :  { %v1372_v63 = vadd.f32 %v1371_v61, %v1370_v60 }
 0x21c   :  { %v1406_v2 = vpop.f32.mrf.mxu1 }
 0x21d   :  { %v994_v56 = vmul.f32 0.00048828125, %v1372_v63  ;;  %v1407_v5 = vadd.f32 %v1406_v2, %v1405_v7 }
 0x21f   :  { %v996_v58 = vmul.f32 %v994_v56, %v994_v56  ;;  %v995_v13 = vmul.f32 0.00048828125, %v1407_v5 }
 0x221   :  { %v997_v17 = vsub.f32 %v995_v13, %v996_v58 }
 0x223   :  { %v999_v19 = vadd.f32 1e-05, %v997_v17 }
 0x225   :  { %1409 = vrsqrt.f32 %v999_v19 }
 0x232   :  { %v1410_v37 = vpop.eup %1409 }
 0x233   :  { %v1001_v40 = vmul.f32 %v1410_v37, %v998_v35 }
 0x235   :  { %1336 = vmatmul.mubr.msk.f32.vlgmr.msra.gmra.mxu0 %vm1007_vm0, %v1001_v40  ;;  %v1003_v51 = vmul.f32 %v1001_v40, %v994_v56 }
 0x237   :  { %v1004_v39 = vsub.f32 %v1002_v49, %v1003_v51 }
 0x239   :  { %1337 = vmatmul.mubr.msk.f32.vlgmr.msra.gmra.mxu1 %vm1007_vm0, %v1004_v39 }
 0x2f5   :  { %v1077_v53 = vpop.f32.mrf.mxu0 }
 0x2f6   :  { %v1159_v29 = vrot.slane %v1077_v53, %v2318_v34 }
 0x2f7   :  { %v1079_v55 = vpop.f32.mrf.mxu0 }
 0x2f8   :  { %v1164_v54 = vmul.f32 %v1159_v29, %v2340_v23  ;;  %v1166_v59 = vmul.f32 %v1159_v29, %v2335_v11  ;;  %v1168_v3 = vmul.f32 %v1159_v29, %v2346_v27  ;;  %v1170_v4 = vmul.f32 %v1159_v29, %v2357_v43 }
 0x2f9   :  { %v1151_v1 = vpop.f32.mrf.mxu1  ;;  %v1163_v9 = vrot.slane %v1079_v55, %v2318_v34  ;;  %v1220_v12 = vmul.f32 %v1159_v29, %v2390_v30  ;;  %v1222_v14 = vmul.f32 %v1159_v29, %v2387_v0  ;;  %v1224_v18 = vmul.f32 %v1159_v29, %v2400_v47 }
 0x2fa   :  { %v1175_v8 = vrot.slane %v1151_v1, %v2318_v34  ;;  %v1226_v21 = vmul.f32 %v1159_v29, %v2425_v16 }
 0x2fb   :  { %v1165_v23 = vmul.f32 %v1163_v9, %v2349_v33  ;;  %v1167_v11 = vmul.f32 %v1163_v9, %v2343_v25  ;;  %v1169_v27 = vmul.f32 %v1163_v9, %v2354_v41  ;;  %v1171_v43 = vmul.f32 %v1163_v9, %v2369_v57  ;;  %v1153_v26 = vpop.f32.mrf.mxu1 }
 0x2fc   :  { %v1221_v10 = vmul.f32 %v1163_v9, %v2397_v45  ;;  %v1223_v31 = vmul.f32 %v1163_v9, %v2393_v15  ;;  %v1225_v30 = vmul.f32 %v1163_v9, %v2415_v6  ;;  %v1227_v0 = vmul.f32 %v1163_v9, %v2429_v36 }
 0x2fd   :  { %v1180_v20 = vadd.f32 %v1175_v8, %v1164_v54  ;;  %v1182_v47 = vadd.f32 %v1175_v8, %v1166_v59  ;;  %v1184_v24 = vadd.f32 %v1175_v8, %v1168_v3  ;;  %v1186_v16 = vadd.f32 %v1175_v8, %v1170_v4 }
 0x2fe   :  { %v1228_v33 = vadd.f32 %v1220_v12, %v1175_v8  ;;  %v1230_v32 = vadd.f32 %v1222_v14, %v1175_v8  ;;  %v1232_v25 = vadd.f32 %v1224_v18, %v1175_v8  ;;  %v1234_v38 = vadd.f32 %v1226_v21, %v1175_v8 }
 0x2ff   :  { %vm1188_vm1 = vcmp.ge.f32.partialorder %v1180_v20, 0.0  ;;  %vm1190_vm2 = vcmp.ge.f32.partialorder %v1182_v47, 0.0  ;;  %vm1192_vm3 = vcmp.ge.f32.partialorder %v1184_v24, 0.0  ;;  %vm1194_vm4 = vcmp.ge.f32.partialorder %v1186_v16, 0.0 }
 0x300   :  { %v1196_v41 = vmul.f32 0.2, %v1180_v20  ;;  %v1198_v57 = vmul.f32 0.2, %v1182_v47  ;;  %v1200_v15 = vmul.f32 0.2, %v1184_v24  ;;  %v1179_v45 = vrot.slane %v1153_v26, %v2318_v34 }
 0x301   :  { %v1202_v6 = vmul.f32 0.2, %v1186_v16  ;;  %vm1236_vm5 = vcmp.ge.f32.partialorder %v1228_v33, 0.0  ;;  %vm1238_vm6 = vcmp.ge.f32.partialorder %v1230_v32, 0.0  ;;  %vm1240_vm7 = vcmp.ge.f32.partialorder %v1232_v25, 0.0 }
 0x302   :  { %v1204_v36 = vsel %vm1188_vm1, %v1180_v20, %v1196_v41  ;;  %v1206_v42 = vsel %vm1190_vm2, %v1182_v47, %v1198_v57  ;;  %v1208_v44 = vsel %vm1192_vm3, %v1184_v24, %v1200_v15  ;;  %vm1242_vm8 = vcmp.ge.f32.partialorder %v1234_v38, 0.0 }
 0x303   :  { %v1210_v46 = vsel %vm1194_vm4, %v1186_v16, %v1202_v6  ;;  %1212 = vst [vmem:[%s2530_s7] sm:$0xff] %v1204_v36  ;;  %1214 = vst [vmem:[%s2530_s7 + $0x10] sm:$0xff] %v1206_v42  ;;  %v1244_v34 = vmul.f32 0.2, %v1228_v33  ;;  %v1246_v48 = vmul.f32 0.2, %v1230_v32  ;;  %v1181_v62 = vadd.f32 %v1179_v45, %v1165_v23 }
 0x304   :  { %1216 = vst [vmem:[%s2530_s7 + $0x20] sm:$0xff] %v1208_v44  ;;  %v1248_v22 = vmul.f32 0.2, %v1232_v25  ;;  %1218 = vst [vmem:[%s2530_s7 + $0x30] sm:$0xff] %v1210_v46  ;;  %v1250_v28 = vmul.f32 0.2, %v1234_v38  ;;  %v1183_v50 = vadd.f32 %v1179_v45, %v1167_v11  ;;  %v1185_v52 = vadd.f32 %v1179_v45, %v1169_v27 }
 0x305   :  { %v1252_v60 = vsel %vm1236_vm5, %v1228_v33, %v1244_v34  ;;  %v1254_v61 = vsel %vm1238_vm6, %v1230_v32, %v1246_v48  ;;  %v1187_v63 = vadd.f32 %v1179_v45, %v1171_v43  ;;  %vm1189_vm9 = vcmp.ge.f32.partialorder %v1181_v62, 0.0 }
 0x306   :  { %v1256_v7 = vsel %vm1240_vm7, %v1232_v25, %v1248_v22  ;;  %v1258_v2 = vsel %vm1242_vm8, %v1234_v38, %v1250_v28  ;;  %1260 = vst [vmem:[%s2530_s7 + $0x40] sm:$0xff] %v1252_v60  ;;  %1262 = vst [vmem:[%s2530_s7 + $0x50] sm:$0xff] %v1254_v61  ;;  %vm1191_vm10 = vcmp.ge.f32.partialorder %v1183_v50, 0.0  ;;  %vm1193_vm11 = vcmp.ge.f32.partialorder %v1185_v52, 0.0 }
 0x307   :  { %1264 = vst [vmem:[%s2530_s7 + $0x60] sm:$0xff] %v1256_v7  ;;  %1266 = vst [vmem:[%s2530_s7 + $0x70] sm:$0xff] %v1258_v2  ;;  %vm1195_vm12 = vcmp.ge.f32.partialorder %v1187_v63, 0.0  ;;  %v1197_v56 = vmul.f32 0.2, %v1181_v62  ;;  %v1229_v58 = vadd.f32 %v1221_v10, %v1179_v45  ;;  %v1231_v19 = vadd.f32 %v1223_v31, %v1179_v45 }
 0x308   :  { %v1199_v5 = vmul.f32 0.2, %v1183_v50  ;;  %v1201_v13 = vmul.f32 0.2, %v1185_v52  ;;  %v1203_v17 = vmul.f32 0.2, %v1187_v63  ;;  %v1233_v35 = vadd.f32 %v1225_v30, %v1179_v45 }
 0x309   :  { %v1205_v37 = vsel %vm1189_vm9, %v1181_v62, %v1197_v56  ;;  %v1235_v49 = vadd.f32 %v1227_v0, %v1179_v45  ;;  %vm1237_vm13 = vcmp.ge.f32.partialorder %v1229_v58, 0.0  ;;  %vm1239_vm14 = vcmp.ge.f32.partialorder %v1231_v19, 0.0 }
 0x30a   :  { %v1207_v40 = vsel %vm1191_vm10, %v1183_v50, %v1199_v5  ;;  %v1209_v51 = vsel %vm1193_vm11, %v1185_v52, %v1201_v13  ;;  %v1211_v39 = vsel %vm1195_vm12, %v1187_v63, %v1203_v17  ;;  %1213 = vst [vmem:[%s2530_s7 + $0x8] sm:$0xff] %v1205_v37  ;;  %vm1241_vm15 = vcmp.ge.f32.partialorder %v1233_v35, 0.0 }
 0x30b   :  { %1215 = vst [vmem:[%s2530_s7 + $0x18] sm:$0xff] %v1207_v40  ;;  %1217 = vst [vmem:[%s2530_s7 + $0x28] sm:$0xff] %v1209_v51  ;;  %vm1243_vm0 = vcmp.ge.f32.partialorder %v1235_v49, 0.0  ;;  %v1245_v53 = vmul.f32 0.2, %v1229_v58 }
 0x30c   :  { %1219 = vst [vmem:[%s2530_s7 + $0x38] sm:$0xff] %v1211_v39  ;;  %v1247_v29 = vmul.f32 0.2, %v1231_v19  ;;  %v1249_v55 = vmul.f32 0.2, %v1233_v35 }
 0x30d   :  { %v1251_v54 = vmul.f32 0.2, %v1235_v49  ;;  %v1253_v59 = vsel %vm1237_vm13, %v1229_v58, %v1245_v53 }
 0x30e   :  { %v1255_v1 = vsel %vm1239_vm14, %v1231_v19, %v1247_v29  ;;  %v1257_v3 = vsel %vm1241_vm15, %v1233_v35, %v1249_v55  ;;  %1261 = vst [vmem:[%s2530_s7 + $0x48] sm:$0xff] %v1253_v59 }
 0x30f   :  { %v1259_v4 = vsel %vm1243_vm0, %v1235_v49, %v1251_v54  ;;  %1263 = vst [vmem:[%s2530_s7 + $0x58] sm:$0xff] %v1255_v1  ;;  %1265 = vst [vmem:[%s2530_s7 + $0x68] sm:$0xff] %v1257_v3 }
 0x310   :  { %1267 = vst [vmem:[%s2530_s7 + $0x78] sm:$0xff] %v1259_v4 }

</bundles_post_ra>
